<compile_context>
chip_gen: v7x
topology: tpu7x:2x2x1
jax: 0.10.0
libtpu: 0.0.40
codegen_flags: <defaults>
</compile_context>

<pallas_src>
import functools

import jax
import jax.numpy as jnp
from jax.experimental import pallas as pl
from jax.experimental.pallas import tpu as pltpu

K, S, P = 4, 2, 1            # kernel size, stride, padding (all conv layers)
NEG_SLOPE = 0.2
LANE = 128                   # vreg lane width / MXU alignment target

TM_MAX = 1024                # patches rows per tile
TK_MAX = 1024                # contraction (K*K*Cin) per tile
TN_MAX = 512                 # output channels per tile
VMEM_LIMIT = 48 * 1024 * 1024


def _cdiv(a, b):
    return -(-a // b)


def _round_up(x, m):
    return _cdiv(x, m) * m


def _choose_tile(dim, max_tile):
    """Pick a multiple-of-128 tile and the padded dim size for a GEMM axis.

    The axis is padded up to the chosen tile so every grid block is full
    (fixes the tile-vs-padding mismatch of the previous version)."""
    d = _round_up(dim, LANE)
    if d <= max_tile:
        return d, d
    best_key, best = None, (LANE, d)
    for t in range(max_tile, LANE - 1, -LANE):
        p = _round_up(d, t)
        key = (p // t, p, -t)          # fewest blocks, least padding, biggest tile
        if best_key is None or key < best_key:
            best_key, best = key, (t, p)
    return best


def _choose_m_tile(M, n_j_blocks):
    tm, Mp = _choose_tile(M, TM_MAX)
    # v7x megacore: make sure the parallel (i, j) grid axes expose >= 2 blocks so
    # both TensorCores get work; harmless (tiny extra padding) on v5e/v6e.
    if n_j_blocks * (Mp // tm) < 2 and _round_up(M, LANE) >= 2 * LANE:
        tm = _round_up(_cdiv(_round_up(M, LANE), 2), LANE)
        Mp = 2 * tm
    return tm, Mp


# ---------------------------------------------------------------------------
# Pallas kernels: tiled GEMM + bias + (optional) LeakyReLU, f32 accumulation
# ---------------------------------------------------------------------------
def _gemm_single_k_kernel(p_ref, w_ref, b_ref, o_ref, *, apply_leaky):
    # Single reduction step: no accumulator scratch, write dot + bias directly.
    out = jnp.dot(p_ref[...], w_ref[...], preferred_element_type=jnp.float32)
    out = out + b_ref[...]                               # (1, tn) broadcasts over rows
    if apply_leaky:
        out = jnp.where(out >= 0, out, out * NEG_SLOPE)
    o_ref[...] = out.astype(o_ref.dtype)


def _gemm_multi_k_kernel(p_ref, w_ref, b_ref, o_ref, acc_ref, *, apply_leaky):
    k = pl.program_id(2)

    @pl.when(k == 0)
    def _init():
        # Seed the accumulator with the bias (drops the finalize add).
        acc_ref[...] = jnp.broadcast_to(b_ref[...], acc_ref.shape)

    acc_ref[...] += jnp.dot(p_ref[...], w_ref[...],
                            preferred_element_type=jnp.float32)

    @pl.when(k == pl.num_programs(2) - 1)
    def _finalize():
        out = acc_ref[...]
        if apply_leaky:
            out = jnp.where(out >= 0, out, out * NEG_SLOPE)
        o_ref[...] = out.astype(o_ref.dtype)


def _conv_gemm(patches, w2d, b2d, cout, apply_leaky, out_dtype):
    M, Kd = patches.shape
    Kp, Cp = w2d.shape
    tk, kp_chk = _choose_tile(Kd, TK_MAX)
    tn, cp_chk = _choose_tile(cout, TN_MAX)
    assert (Kp, Cp) == (kp_chk, cp_chk), "prepared weights do not match the GEMM tiling"
    tm, Mp = _choose_m_tile(M, Cp // tn)

    patches = jnp.pad(patches, ((0, Mp - M), (0, Kp - Kd)))   # bf16, zero-padded

    mb, nb, kb = Mp // tm, Cp // tn, Kp // tk

    # Triple-buffer the streamed patches operand on large (mem-bound) layers.
    a_kwargs = {}
    if mb * kb >= 4:
        a_kwargs["pipeline_mode"] = pl.Buffered(3)

    out_bytes = 4 if out_dtype == jnp.float32 else 2
    cost = pl.CostEstimate(
        flops=2 * Mp * Kp * Cp,
        transcendentals=0,
        bytes_accessed=Mp * Kp * 2 + Kp * Cp * 2 + Mp * Cp * out_bytes,
    )

    if kb == 1:
        kern = functools.partial(_gemm_single_k_kernel, apply_leaky=apply_leaky)
        grid_spec = pltpu.PrefetchScalarGridSpec(
            num_scalar_prefetch=0,
            grid=(mb, nb),
            in_specs=[
                pl.BlockSpec((tm, tk), lambda i, j: (i, 0), **a_kwargs),
                pl.BlockSpec((tk, tn), lambda i, j: (0, j)),
                pl.BlockSpec((1, tn), lambda i, j: (0, j)),
            ],
            out_specs=pl.BlockSpec((tm, tn), lambda i, j: (i, j)),
        )
        dims = ("parallel", "parallel")
    else:
        kern = functools.partial(_gemm_multi_k_kernel, apply_leaky=apply_leaky)
        grid_spec = pltpu.PrefetchScalarGridSpec(
            num_scalar_prefetch=0,
            grid=(mb, nb, kb),
            in_specs=[
                pl.BlockSpec((tm, tk), lambda i, j, k: (i, k), **a_kwargs),
                pl.BlockSpec((tk, tn), lambda i, j, k: (k, j)),
                pl.BlockSpec((1, tn), lambda i, j, k: (0, j)),
            ],
            out_specs=pl.BlockSpec((tm, tn), lambda i, j, k: (i, j)),
            scratch_shapes=[pltpu.VMEM((tm, tn), jnp.float32)],
        )
        dims = ("parallel", "parallel", "arbitrary")

    out = pl.pallas_call(
        kern,
        out_shape=jax.ShapeDtypeStruct((Mp, Cp), out_dtype),
        grid_spec=grid_spec,
        compiler_params=pltpu.CompilerParams(
            dimension_semantics=dims,
            vmem_limit_bytes=VMEM_LIMIT,
        ),
        cost_estimate=cost,
    )(patches, w2d, b2d)

    return out[:M, :cout]


# ---------------------------------------------------------------------------
# Glue: im2col for a 4x4 / stride-2 / pad-1 conv (NHWC, bf16)
# ---------------------------------------------------------------------------
def _im2col(x):
    N, H, W, C = x.shape
    Ho = (H + 2 * P - K) // S + 1
    Wo = (W + 2 * P - K) // S + 1
    xp = jnp.pad(x, ((0, 0), (P, P), (P, P), (0, 0)))
    cols = []
    for kh in range(K):
        for kw in range(K):
            cols.append(
                jax.lax.slice(
                    xp,
                    (0, kh, kw, 0),
                    (N, kh + S * (Ho - 1) + 1, kw + S * (Wo - 1) + 1, C),
                    (1, S, S, 1),
                )
            )  # (N, Ho, Wo, C)
    patches = jnp.stack(cols, axis=3)            # (N, Ho, Wo, K*K, C)
    return patches.reshape(N * Ho * Wo, K * K * C), Ho, Wo


def _conv_layer(x, w2d, b2d, cout, apply_leaky, out_dtype):
    N = x.shape[0]
    patches, Ho, Wo = _im2col(x)
    out = _conv_gemm(patches, w2d, b2d, cout, apply_leaky, out_dtype)
    return out.reshape(N, Ho, Wo, cout)


# ---------------------------------------------------------------------------
# Parameters
# ---------------------------------------------------------------------------
def init_params(key, num_classes, ndf):
    chans = [num_classes, ndf, ndf * 2, ndf * 4, ndf * 8, 1]
    params = []
    for i in range(5):
        cin, cout = chans[i], chans[i + 1]
        key, kw_, kb_ = jax.random.split(key, 3)
        fan_in = cin * K * K
        w = jax.random.normal(kw_, (K, K, cin, cout), jnp.float32) * (1.0 / fan_in) ** 0.5
        b = jax.random.normal(kb_, (cout,), jnp.float32) * 0.01
        params.append((w, b))
    return params


def prepare_params(params):
    """One-time prep (outside the forward): flatten HWIO weights, zero-pad to the
    GEMM tiling and cast weights to bf16 / bias to f32."""
    prepared = []
    for w, b in params:
        kd = w.shape[0] * w.shape[1] * w.shape[2]
        cout = w.shape[3]
        _, Kp = _choose_tile(kd, TK_MAX)
        _, Cp = _choose_tile(cout, TN_MAX)
        w2d = jnp.pad(w.reshape(kd, cout),
                      ((0, Kp - kd), (0, Cp - cout))).astype(jnp.bfloat16)
        b2d = jnp.pad(b.reshape(1, cout),
                      ((0, 0), (0, Cp - cout))).astype(jnp.float32)
        prepared.append((w2d, b2d))
    return prepared


# ---------------------------------------------------------------------------
# FCDiscriminator forward
# ---------------------------------------------------------------------------
@functools.partial(jax.jit, static_argnames=("ndf",))
def fc_discriminator(x_nchw, prepared, ndf):
    couts = (ndf, ndf * 2, ndf * 4, ndf * 8, 1)
    x = jnp.transpose(x_nchw, (0, 2, 3, 1)).astype(jnp.bfloat16)   # NCHW -> NHWC, bf16
    n_layers = len(prepared)
    for i, (w2d, b2d) in enumerate(prepared):
        last = i == n_layers - 1
        x = _conv_layer(
            x, w2d, b2d, couts[i],
            apply_leaky=not last,                                  # classifier: no LeakyReLU
            out_dtype=jnp.float32 if last else jnp.bfloat16,
        )
    return jnp.transpose(x, (0, 3, 1, 2))                          # NHWC -> NCHW


# ---------------------------------------------------------------------------
# Pure-JAX reference (lax.conv) with matching bf16-activation / f32-acc numerics
# ---------------------------------------------------------------------------
def _reference(x_nchw, params):
    x = jnp.transpose(x_nchw, (0, 2, 3, 1)).astype(jnp.bfloat16)
    n = len(params)
    for i, (w, b) in enumerate(params):
        y = jax.lax.conv_general_dilated(
            x.astype(jnp.bfloat16), w.astype(jnp.bfloat16),
            window_strides=(S, S), padding=((P, P), (P, P)),
            dimension_numbers=("NHWC", "HWIO", "NHWC"),
            preferred_element_type=jnp.float32,
        ) + b
        if i < n - 1:
            y = jnp.where(y >= 0, y, y * NEG_SLOPE).astype(jnp.bfloat16)
        x = y
    return jnp.transpose(x, (0, 3, 1, 2))


if __name__ == "__main__":
    def _run_case(key, num_classes, ndf, N, Hin, Win):
        key, kx = jax.random.split(key)
        x = jax.random.normal(kx, (N, num_classes, Hin, Win), jnp.float32)
        params = init_params(key, num_classes, ndf)
        prepared = prepare_params(params)
        out = jax.block_until_ready(fc_discriminator(x, prepared, ndf=ndf))
        ref = jax.block_until_ready(_reference(x, params))
        assert out.shape == (N, 1, 1, 1), out.shape
        assert jnp.allclose(out, ref, atol=1e-2, rtol=1e-2), "mismatch vs lax.conv reference"

    key = jax.random.PRNGKey(0)
    # 32 -> 16 -> 8 -> 4 -> 2 -> 1 spatial pyramid.
    _run_case(key, num_classes=4, ndf=8, N=2, Hin=32, Win=32)    # single-k GEMM path
    _run_case(key, num_classes=4, ndf=16, N=1, Hin=32, Win=32)   # multi-k (accumulator) path
    print("KERNEL_OK")
</pallas_src>

<mosaic_0001>
module attributes {stable_mosaic.version = 11 : i64} {
  func.func @_gemm_single_k_kernel(%arg0: i32, %arg1: i32, %arg2: memref<256x128xbf16, #tpu.memory_space<vmem>>, %arg3: memref<128x128xbf16, #tpu.memory_space<vmem>>, %arg4: memref<1x128xf32, #tpu.memory_space<vmem>>, %arg5: memref<256x128xbf16, #tpu.memory_space<vmem>>) attributes {dimension_semantics = [#tpu.dimension_semantics<parallel>, #tpu.dimension_semantics<parallel>], iteration_bounds = array<i64: 2, 1>, scalar_prefetch = 0 : i64, scratch_operands = 0 : i64, tpu.core_type = #tpu.core_type<tc>, window_params = [{transform_indices = @transform_0, window_bounds = array<i64: 256, 128>}, {transform_indices = @transform_1, window_bounds = array<i64: 128, 128>}, {transform_indices = @transform_2, window_bounds = array<i64: 1, 128>}, {transform_indices = @transform_3, window_bounds = array<i64: 256, 128>}]} {
    %c0 = arith.constant 0 : index
    %c0_0 = arith.constant 0 : index
    %0 = vector.load %arg2[%c0, %c0_0] : memref<256x128xbf16, #tpu.memory_space<vmem>>, vector<256x128xbf16>
    %c0_1 = arith.constant 0 : index
    %c0_2 = arith.constant 0 : index
    %1 = vector.load %arg3[%c0_1, %c0_2] : memref<128x128xbf16, #tpu.memory_space<vmem>>, vector<128x128xbf16>
    %cst = arith.constant dense<0.000000e+00> : vector<256x128xf32>
    %2 = tpu.matmul %0, %1, %cst {dimension_numbers = #tpu.dot_dimension_numbers<[1], [0], [0], [1], [0, 0, 1, 1], [], []>} : vector<256x128xbf16>, vector<128x128xbf16>, vector<256x128xf32> -> vector<256x128xf32>
    %c0_3 = arith.constant 0 : index
    %c0_4 = arith.constant 0 : index
    %3 = vector.load %arg4[%c0_3, %c0_4] : memref<1x128xf32, #tpu.memory_space<vmem>>, vector<1x128xf32>
    %4 = vector.broadcast %3 : vector<1x128xf32> to vector<256x128xf32>
    %5 = arith.addf %2, %4 : vector<256x128xf32>
    %cst_5 = arith.constant 0.000000e+00 : f32
    %6 = vector.broadcast %cst_5 : f32 to vector<256x128xf32>
    %7 = arith.cmpf oge, %5, %6 : vector<256x128xf32>
    %cst_6 = arith.constant 2.000000e-01 : f32
    %8 = vector.broadcast %cst_6 : f32 to vector<256x128xf32>
    %9 = arith.mulf %5, %8 : vector<256x128xf32>
    %10 = arith.select %7, %5, %9 : vector<256x128xi1>, vector<256x128xf32>
    %11 = arith.truncf %10 : vector<256x128xf32> to vector<256x128xbf16>
    %c0_7 = arith.constant 0 : index
    %c0_8 = arith.constant 0 : index
    %12 = vector.load %arg5[%c0_7, %c0_8] : memref<256x128xbf16, #tpu.memory_space<vmem>>, vector<256x128xbf16>
    tpu.vector_store %arg5[%c0_7, %c0_8], %11 {strides = array<i32>} : memref<256x128xbf16, #tpu.memory_space<vmem>>, vector<256x128xbf16>,
    return
  }
  func.func @transform_0(%arg0: i32, %arg1: i32) -> (i32, i32) {
    %c0_i32 = arith.constant 0 : i32
    %c0_i32_0 = arith.constant 0 : i32
    return %arg0, %c0_i32 : i32, i32
  }
  func.func @transform_1(%arg0: i32, %arg1: i32) -> (i32, i32) {
    %c0_i32 = arith.constant 0 : i32
    %c0_i32_0 = arith.constant 0 : i32
    return %c0_i32, %arg1 : i32, i32
  }
  func.func @transform_2(%arg0: i32, %arg1: i32) -> (i32, i32) {
    %c0_i32 = arith.constant 0 : i32
    %c0_i32_0 = arith.constant 0 : i32
    return %c0_i32, %arg1 : i32, i32
  }
  func.func @transform_3(%arg0: i32, %arg1: i32) -> (i32, i32) {
    %c0_i32 = arith.constant 0 : i32
    return %arg0, %arg1 : i32, i32
  }
}

module attributes {stable_mosaic.version = 11 : i64} {
  func.func @_gemm_single_k_kernel(%arg0: i32, %arg1: i32, %arg2: memref<128x128xbf16, #tpu.memory_space<vmem>>, %arg3: memref<128x128xbf16, #tpu.memory_space<vmem>>, %arg4: memref<1x128xf32, #tpu.memory_space<vmem>>, %arg5: memref<128x128xbf16, #tpu.memory_space<vmem>>) attributes {dimension_semantics = [#tpu.dimension_semantics<parallel>, #tpu.dimension_semantics<parallel>], iteration_bounds = array<i64: 1, 1>, scalar_prefetch = 0 : i64, scratch_operands = 0 : i64, tpu.core_type = #tpu.core_type<tc>, window_params = [{transform_indices = @transform_0, window_bounds = array<i64: 128, 128>}, {transform_indices = @transform_1, window_bounds = array<i64: 128, 128>}, {transform_indices = @transform_2, window_bounds = array<i64: 1, 128>}, {transform_indices = @transform_3, window_bounds = array<i64: 128, 128>}]} {
    %c0 = arith.constant 0 : index
    %c0_0 = arith.constant 0 : index
    %0 = vector.load %arg2[%c0, %c0_0] : memref<128x128xbf16, #tpu.memory_space<vmem>>, vector<128x128xbf16>
    %c0_1 = arith.constant 0 : index
    %c0_2 = arith.constant 0 : index
    %1 = vector.load %arg3[%c0_1, %c0_2] : memref<128x128xbf16, #tpu.memory_space<vmem>>, vector<128x128xbf16>
    %cst = arith.constant dense<0.000000e+00> : vector<128x128xf32>
    %2 = tpu.matmul %0, %1, %cst {dimension_numbers = #tpu.dot_dimension_numbers<[1], [0], [0], [1], [0, 0, 1, 1], [], []>} : vector<128x128xbf16>, vector<128x128xbf16>, vector<128x128xf32> -> vector<128x128xf32>
    %c0_3 = arith.constant 0 : index
    %c0_4 = arith.constant 0 : index
    %3 = vector.load %arg4[%c0_3, %c0_4] : memref<1x128xf32, #tpu.memory_space<vmem>>, vector<1x128xf32>
    %4 = vector.broadcast %3 : vector<1x128xf32> to vector<128x128xf32>
    %5 = arith.addf %2, %4 : vector<128x128xf32>
    %cst_5 = arith.constant 0.000000e+00 : f32
    %6 = vector.broadcast %cst_5 : f32 to vector<128x128xf32>
    %7 = arith.cmpf oge, %5, %6 : vector<128x128xf32>
    %cst_6 = arith.constant 2.000000e-01 : f32
    %8 = vector.broadcast %cst_6 : f32 to vector<128x128xf32>
    %9 = arith.mulf %5, %8 : vector<128x128xf32>
    %10 = arith.select %7, %5, %9 : vector<128x128xi1>, vector<128x128xf32>
    %11 = arith.truncf %10 : vector<128x128xf32> to vector<128x128xbf16>
    %c0_7 = arith.constant 0 : index
    %c0_8 = arith.constant 0 : index
    %12 = vector.load %arg5[%c0_7, %c0_8] : memref<128x128xbf16, #tpu.memory_space<vmem>>, vector<128x128xbf16>
    tpu.vector_store %arg5[%c0_7, %c0_8], %11 {strides = array<i32>} : memref<128x128xbf16, #tpu.memory_space<vmem>>, vector<128x128xbf16>,
    return
  }
  func.func @transform_0(%arg0: i32, %arg1: i32) -> (i32, i32) {
    %c0_i32 = arith.constant 0 : i32
    %c0_i32_0 = arith.constant 0 : i32
    return %arg0, %c0_i32 : i32, i32
  }
  func.func @transform_1(%arg0: i32, %arg1: i32) -> (i32, i32) {
    %c0_i32 = arith.constant 0 : i32
    %c0_i32_0 = arith.constant 0 : i32
    return %c0_i32, %arg1 : i32, i32
  }
  func.func @transform_2(%arg0: i32, %arg1: i32) -> (i32, i32) {
    %c0_i32 = arith.constant 0 : i32
    %c0_i32_0 = arith.constant 0 : i32
    return %c0_i32, %arg1 : i32, i32
  }
  func.func @transform_3(%arg0: i32, %arg1: i32) -> (i32, i32) {
    %c0_i32 = arith.constant 0 : i32
    return %arg0, %arg1 : i32, i32
  }
}

module attributes {stable_mosaic.version = 11 : i64} {
  func.func @_gemm_single_k_kernel(%arg0: i32, %arg1: i32, %arg2: memref<128x256xbf16, #tpu.memory_space<vmem>>, %arg3: memref<256x128xbf16, #tpu.memory_space<vmem>>, %arg4: memref<1x128xf32, #tpu.memory_space<vmem>>, %arg5: memref<128x128xbf16, #tpu.memory_space<vmem>>) attributes {dimension_semantics = [#tpu.dimension_semantics<parallel>, #tpu.dimension_semantics<parallel>], iteration_bounds = array<i64: 1, 1>, scalar_prefetch = 0 : i64, scratch_operands = 0 : i64, tpu.core_type = #tpu.core_type<tc>, window_params = [{transform_indices = @transform_0, window_bounds = array<i64: 128, 256>}, {transform_indices = @transform_1, window_bounds = array<i64: 256, 128>}, {transform_indices = @transform_2, window_bounds = array<i64: 1, 128>}, {transform_indices = @transform_3, window_bounds = array<i64: 128, 128>}]} {
    %c0 = arith.constant 0 : index
    %c0_0 = arith.constant 0 : index
    %0 = vector.load %arg2[%c0, %c0_0] : memref<128x256xbf16, #tpu.memory_space<vmem>>, vector<128x256xbf16>
    %c0_1 = arith.constant 0 : index
    %c0_2 = arith.constant 0 : index
    %1 = vector.load %arg3[%c0_1, %c0_2] : memref<256x128xbf16, #tpu.memory_space<vmem>>, vector<256x128xbf16>
    %cst = arith.constant dense<0.000000e+00> : vector<128x128xf32>
    %2 = tpu.matmul %0, %1, %cst {dimension_numbers = #tpu.dot_dimension_numbers<[1], [0], [0], [1], [0, 0, 1, 1], [], []>} : vector<128x256xbf16>, vector<256x128xbf16>, vector<128x128xf32> -> vector<128x128xf32>
    %c0_3 = arith.constant 0 : index
    %c0_4 = arith.constant 0 : index
    %3 = vector.load %arg4[%c0_3, %c0_4] : memref<1x128xf32, #tpu.memory_space<vmem>>, vector<1x128xf32>
    %4 = vector.broadcast %3 : vector<1x128xf32> to vector<128x128xf32>
    %5 = arith.addf %2, %4 : vector<128x128xf32>
    %cst_5 = arith.constant 0.000000e+00 : f32
    %6 = vector.broadcast %cst_5 : f32 to vector<128x128xf32>
    %7 = arith.cmpf oge, %5, %6 : vector<128x128xf32>
    %cst_6 = arith.constant 2.000000e-01 : f32
    %8 = vector.broadcast %cst_6 : f32 to vector<128x128xf32>
    %9 = arith.mulf %5, %8 : vector<128x128xf32>
    %10 = arith.select %7, %5, %9 : vector<128x128xi1>, vector<128x128xf32>
    %11 = arith.truncf %10 : vector<128x128xf32> to vector<128x128xbf16>
    %c0_7 = arith.constant 0 : index
    %c0_8 = arith.constant 0 : index
    %12 = vector.load %arg5[%c0_7, %c0_8] : memref<128x128xbf16, #tpu.memory_space<vmem>>, vector<128x128xbf16>
    tpu.vector_store %arg5[%c0_7, %c0_8], %11 {strides = array<i32>} : memref<128x128xbf16, #tpu.memory_space<vmem>>, vector<128x128xbf16>,
    return
  }
  func.func @transform_0(%arg0: i32, %arg1: i32) -> (i32, i32) {
    %c0_i32 = arith.constant 0 : i32
    %c0_i32_0 = arith.constant 0 : i32
    return %arg0, %c0_i32 : i32, i32
  }
  func.func @transform_1(%arg0: i32, %arg1: i32) -> (i32, i32) {
    %c0_i32 = arith.constant 0 : i32
    %c0_i32_0 = arith.constant 0 : i32
    return %c0_i32, %arg1 : i32, i32
  }
  func.func @transform_2(%arg0: i32, %arg1: i32) -> (i32, i32) {
    %c0_i32 = arith.constant 0 : i32
    %c0_i32_0 = arith.constant 0 : i32
    return %c0_i32, %arg1 : i32, i32
  }
  func.func @transform_3(%arg0: i32, %arg1: i32) -> (i32, i32) {
    %c0_i32 = arith.constant 0 : i32
    return %arg0, %arg1 : i32, i32
  }
}

module attributes {stable_mosaic.version = 11 : i64} {
  func.func @_gemm_single_k_kernel(%arg0: i32, %arg1: i32, %arg2: memref<128x512xbf16, #tpu.memory_space<vmem>>, %arg3: memref<512x128xbf16, #tpu.memory_space<vmem>>, %arg4: memref<1x128xf32, #tpu.memory_space<vmem>>, %arg5: memref<128x128xbf16, #tpu.memory_space<vmem>>) attributes {dimension_semantics = [#tpu.dimension_semantics<parallel>, #tpu.dimension_semantics<parallel>], iteration_bounds = array<i64: 1, 1>, scalar_prefetch = 0 : i64, scratch_operands = 0 : i64, tpu.core_type = #tpu.core_type<tc>, window_params = [{transform_indices = @transform_0, window_bounds = array<i64: 128, 512>}, {transform_indices = @transform_1, window_bounds = array<i64: 512, 128>}, {transform_indices = @transform_2, window_bounds = array<i64: 1, 128>}, {transform_indices = @transform_3, window_bounds = array<i64: 128, 128>}]} {
    %c0 = arith.constant 0 : index
    %c0_0 = arith.constant 0 : index
    %0 = vector.load %arg2[%c0, %c0_0] : memref<128x512xbf16, #tpu.memory_space<vmem>>, vector<128x512xbf16>
    %c0_1 = arith.constant 0 : index
    %c0_2 = arith.constant 0 : index
    %1 = vector.load %arg3[%c0_1, %c0_2] : memref<512x128xbf16, #tpu.memory_space<vmem>>, vector<512x128xbf16>
    %cst = arith.constant dense<0.000000e+00> : vector<128x128xf32>
    %2 = tpu.matmul %0, %1, %cst {dimension_numbers = #tpu.dot_dimension_numbers<[1], [0], [0], [1], [0, 0, 1, 1], [], []>} : vector<128x512xbf16>, vector<512x128xbf16>, vector<128x128xf32> -> vector<128x128xf32>
    %c0_3 = arith.constant 0 : index
    %c0_4 = arith.constant 0 : index
    %3 = vector.load %arg4[%c0_3, %c0_4] : memref<1x128xf32, #tpu.memory_space<vmem>>, vector<1x128xf32>
    %4 = vector.broadcast %3 : vector<1x128xf32> to vector<128x128xf32>
    %5 = arith.addf %2, %4 : vector<128x128xf32>
    %cst_5 = arith.constant 0.000000e+00 : f32
    %6 = vector.broadcast %cst_5 : f32 to vector<128x128xf32>
    %7 = arith.cmpf oge, %5, %6 : vector<128x128xf32>
    %cst_6 = arith.constant 2.000000e-01 : f32
    %8 = vector.broadcast %cst_6 : f32 to vector<128x128xf32>
    %9 = arith.mulf %5, %8 : vector<128x128xf32>
    %10 = arith.select %7, %5, %9 : vector<128x128xi1>, vector<128x128xf32>
    %11 = arith.truncf %10 : vector<128x128xf32> to vector<128x128xbf16>
    %c0_7 = arith.constant 0 : index
    %c0_8 = arith.constant 0 : index
    %12 = vector.load %arg5[%c0_7, %c0_8] : memref<128x128xbf16, #tpu.memory_space<vmem>>, vector<128x128xbf16>
    tpu.vector_store %arg5[%c0_7, %c0_8], %11 {strides = array<i32>} : memref<128x128xbf16, #tpu.memory_space<vmem>>, vector<128x128xbf16>,
    return
  }
  func.func @transform_0(%arg0: i32, %arg1: i32) -> (i32, i32) {
    %c0_i32 = arith.constant 0 : i32
    %c0_i32_0 = arith.constant 0 : i32
    return %arg0, %c0_i32 : i32, i32
  }
  func.func @transform_1(%arg0: i32, %arg1: i32) -> (i32, i32) {
    %c0_i32 = arith.constant 0 : i32
    %c0_i32_0 = arith.constant 0 : i32
    return %c0_i32, %arg1 : i32, i32
  }
  func.func @transform_2(%arg0: i32, %arg1: i32) -> (i32, i32) {
    %c0_i32 = arith.constant 0 : i32
    %c0_i32_0 = arith.constant 0 : i32
    return %c0_i32, %arg1 : i32, i32
  }
  func.func @transform_3(%arg0: i32, %arg1: i32) -> (i32, i32) {
    %c0_i32 = arith.constant 0 : i32
    return %arg0, %arg1 : i32, i32
  }
}

module attributes {stable_mosaic.version = 11 : i64} {
  func.func @_gemm_single_k_kernel(%arg0: i32, %arg1: i32, %arg2: memref<128x1024xbf16, #tpu.memory_space<vmem>>, %arg3: memref<1024x128xbf16, #tpu.memory_space<vmem>>, %arg4: memref<1x128xf32, #tpu.memory_space<vmem>>, %arg5: memref<128x128xf32, #tpu.memory_space<vmem>>) attributes {dimension_semantics = [#tpu.dimension_semantics<parallel>, #tpu.dimension_semantics<parallel>], iteration_bounds = array<i64: 1, 1>, scalar_prefetch = 0 : i64, scratch_operands = 0 : i64, tpu.core_type = #tpu.core_type<tc>, window_params = [{transform_indices = @transform_0, window_bounds = array<i64: 128, 1024>}, {transform_indices = @transform_1, window_bounds = array<i64: 1024, 128>}, {transform_indices = @transform_2, window_bounds = array<i64: 1, 128>}, {transform_indices = @transform_3, window_bounds = array<i64: 128, 128>}]} {
    %c0 = arith.constant 0 : index
    %c0_0 = arith.constant 0 : index
    %0 = vector.load %arg2[%c0, %c0_0] : memref<128x1024xbf16, #tpu.memory_space<vmem>>, vector<128x1024xbf16>
    %c0_1 = arith.constant 0 : index
    %c0_2 = arith.constant 0 : index
    %1 = vector.load %arg3[%c0_1, %c0_2] : memref<1024x128xbf16, #tpu.memory_space<vmem>>, vector<1024x128xbf16>
    %cst = arith.constant dense<0.000000e+00> : vector<128x128xf32>
    %2 = tpu.matmul %0, %1, %cst {dimension_numbers = #tpu.dot_dimension_numbers<[1], [0], [0], [1], [0, 0, 1, 1], [], []>} : vector<128x1024xbf16>, vector<1024x128xbf16>, vector<128x128xf32> -> vector<128x128xf32>
    %c0_3 = arith.constant 0 : index
    %c0_4 = arith.constant 0 : index
    %3 = vector.load %arg4[%c0_3, %c0_4] : memref<1x128xf32, #tpu.memory_space<vmem>>, vector<1x128xf32>
    %4 = vector.broadcast %3 : vector<1x128xf32> to vector<128x128xf32>
    %5 = arith.addf %2, %4 : vector<128x128xf32>
    %c0_5 = arith.constant 0 : index
    %c0_6 = arith.constant 0 : index
    %6 = vector.load %arg5[%c0_5, %c0_6] : memref<128x128xf32, #tpu.memory_space<vmem>>, vector<128x128xf32>
    tpu.vector_store %arg5[%c0_5, %c0_6], %5 {strides = array<i32>} : memref<128x128xf32, #tpu.memory_space<vmem>>, vector<128x128xf32>,
    return
  }
  func.func @transform_0(%arg0: i32, %arg1: i32) -> (i32, i32) {
    %c0_i32 = arith.constant 0 : i32
    %c0_i32_0 = arith.constant 0 : i32
    return %arg0, %c0_i32 : i32, i32
  }
  func.func @transform_1(%arg0: i32, %arg1: i32) -> (i32, i32) {
    %c0_i32 = arith.constant 0 : i32
    %c0_i32_0 = arith.constant 0 : i32
    return %c0_i32, %arg1 : i32, i32
  }
  func.func @transform_2(%arg0: i32, %arg1: i32) -> (i32, i32) {
    %c0_i32 = arith.constant 0 : i32
    %c0_i32_0 = arith.constant 0 : i32
    return %c0_i32, %arg1 : i32, i32
  }
  func.func @transform_3(%arg0: i32, %arg1: i32) -> (i32, i32) {
    %c0_i32 = arith.constant 0 : i32
    return %arg0, %arg1 : i32, i32
  }
}

</mosaic_0001>

<bundles_post_ra>
// kernel: fc_discriminator.5
= control target key start
LH: loop header
LB: loop body
LE: loop exit
PB: predicated region body
PF: predicated region fallthrough
CT: control target
= control target key end

     0   :  { %s1321_s12 = smov 0   ;;  %s1323_s13 = smov 0   ;;  %s1464_s0 = inlined_call_operand.vmem [shape: bf16[512,128], index: 0, kind: input, shape index: {}]   ;;  %s1465_s1 = inlined_call_operand.vmem [shape: bf16[128,128], index: 1, kind: input, shape index: {}]   ;;  %s1466_s2 = inlined_call_operand.vmem [shape: f32[1,128], index: 2, kind: input, shape index: {}]   ;;  %s1467_s3 = inlined_call_operand.vmem [shape: bf16[512,128], index: 3, kind: output, shape index: {}]  }
   0x1   :  { %s1325_s14 = smov 0  }
   0x2 LB: > { %s25_s15 = sadd.s32 1, %s1295_s13  ;;  %p950_p0 = scmp.ge.s32.totalorder %s1299_s14, 1  ;;  %s1299_s14 = sphi %s1325_s14, %s13_s14   ;;  %s1295_s13 = sphi %s1323_s13, %s1469_s13   ;;  %s1291_s12 = sphi %s1321_s12, %s1468_s12  }
   0x3   : > { %p27_p1 = scmp.ge.s32.totalorder %s25_s15, 2  ;;  %p169_p2 = scmp.lt.s32.totalorder %s1299_s14, 3 }
   0x5   : > { %s1471_s15 = smov (%p27_p1, %s25_s15), 0  ;;  %p170_p3 = pnand %p950_p0, %p169_p2 }
   0x6   : > { %v1253_v0 = vld [vmem:[%s1465_s1] sm:$0xff] (!%p170_p3)   ;;  %s951_s18 = sshll.u32 (!%p170_p3), %s1291_s12, 5  ;;  %v1254_v1 = vld [vmem:[%s1465_s1 + $0x8] sm:$0xff] (!%p170_p3)   ;;  %v1255_v2 = vld [vmem:[%s1465_s1 + $0x10] sm:$0xff] (!%p170_p3)  }
   0x7   : > { %173 = sbr.rel (%p170_p3) target bundleno = 294 (0x126), region = 32  ;;  %p204_p4 = scmp.lt.s32.totalorder (!%p170_p3), %s951_s18, 63  ;;  %1165 = vmatprep.subr.bf16.mxu0 (!%p170_p3), %v1253_v0  ;;  %1213 = vmatprep.subr.bf16.mxu1 (!%p170_p3), %v1253_v0  ;;  %v1256_v3 = vld [vmem:[%s1465_s1 + $0x18] sm:$0xff] (!%p170_p3)   ;;  %v1257_v6 = vld [vmem:[%s1465_s1 + $0x20] sm:$0xff] (!%p170_p3)   ;;  %v1258_v7 = vld [vmem:[%s1465_s1 + $0x28] sm:$0xff] (!%p170_p3)  }
   0x8   : > { %1166 = vmatpush3.bf16.msra.mxu0 (!%p170_p3), %v1253_v0  ;;  %1221 = vmatpush3.bf16.msra.mxu1 (!%p170_p3), %v1253_v0  ;;  %v1259_v8 = vld [vmem:[%s1465_s1 + $0x30] sm:$0xff] (!%p170_p3)   ;;  %v1260_v9 = vld [vmem:[%s1465_s1 + $0x38] sm:$0xff] (!%p170_p3)   ;;  %v1392_v24 = vld [vmem:[%s1466_s2] ss:$0 sm:$0xff] (!%p170_p3) }
   0x9   : > { %1167 = vmatprep.subr.bf16.mxu0 (!%p170_p3), %v1254_v1  ;;  %1214 = vmatprep.subr.bf16.mxu1 (!%p170_p3), %v1254_v1 }
   0xc   : > { %1168 = vmatpush3.bf16.msra.mxu0 (!%p170_p3), %v1254_v1  ;;  %1222 = vmatpush3.bf16.msra.mxu1 (!%p170_p3), %v1254_v1 }
   0xd   : > { %1169 = vmatprep.subr.bf16.mxu0 (!%p170_p3), %v1255_v2  ;;  %1215 = vmatprep.subr.bf16.mxu1 (!%p170_p3), %v1255_v2 }
   0xe   : > { %s1473_s18 = smov (!%p204_p4, %s951_s18), 63 }
   0xf   : > { %s952_s23 = sshll.u32 %s1473_s18, 2 }
  0x10   : > { %s1356_s26 = scalar_lea.vmem %s1464_s0, %s952_s23  ;;  %1170 = vmatpush3.bf16.msra.mxu0 %v1255_v2  ;;  %1223 = vmatpush3.bf16.msra.mxu1 %v1255_v2  ;;  %s1409_s17 = scalar_lea.vmem %s1467_s3, %s952_s23 }
  0x11   : > { %v1261_v4 = vld [vmem:[%s1356_s26] sm:$0xff]   ;;  %1171 = vmatprep.subr.bf16.mxu0 %v1256_v3  ;;  %1216 = vmatprep.subr.bf16.mxu1 %v1256_v3  ;;  %v1263_v10 = vld [vmem:[%s1356_s26 + $0x8] sm:$0xff]   ;;  %v1265_v12 = vld [vmem:[%s1356_s26 + $0x10] sm:$0xff]  }
  0x12   : > { %v1262_v5 = vld [vmem:[%s1356_s26 + $0x40] sm:$0xff]   ;;  %1181 = vmatprep.mubr.bf16.mxu0 %v1261_v4  ;;  %v1264_v11 = vld [vmem:[%s1356_s26 + $0x48] sm:$0xff]   ;;  %v1266_v13 = vld [vmem:[%s1356_s26 + $0x50] sm:$0xff]  }
  0x13   : > { %1197 = vmatprep.mubr.bf16.mxu1 %v1262_v5  ;;  %v1267_v14 = vld [vmem:[%s1356_s26 + $0x18] sm:$0xff]   ;;  %v1269_v16 = vld [vmem:[%s1356_s26 + $0x20] sm:$0xff]   ;;  %v1271_v18 = vld [vmem:[%s1356_s26 + $0x28] sm:$0xff]  }
  0x14   : > { %1172 = vmatpush3.bf16.msra.mxu0 %v1256_v3  ;;  %1224 = vmatpush3.bf16.msra.mxu1 %v1256_v3  ;;  %v1268_v15 = vld [vmem:[%s1356_s26 + $0x58] sm:$0xff]   ;;  %v1270_v17 = vld [vmem:[%s1356_s26 + $0x60] sm:$0xff]   ;;  %v1272_v19 = vld [vmem:[%s1356_s26 + $0x68] sm:$0xff]  }
  0x15   : > { %1173 = vmatprep.subr.bf16.mxu0 %v1257_v6  ;;  %1217 = vmatprep.subr.bf16.mxu1 %v1257_v6  ;;  %v1273_v20 = vld [vmem:[%s1356_s26 + $0x30] sm:$0xff]   ;;  %v1275_v22 = vld [vmem:[%s1356_s26 + $0x38] sm:$0xff]  }
  0x16   : > { %v1274_v21 = vld [vmem:[%s1356_s26 + $0x70] sm:$0xff]   ;;  %v1276_v23 = vld [vmem:[%s1356_s26 + $0x78] sm:$0xff]  }
  0x18   : > { %1174 = vmatpush3.bf16.msra.mxu0 %v1257_v6  ;;  %1225 = vmatpush3.bf16.msra.mxu1 %v1257_v6 }
  0x19   : > { %1175 = vmatprep.subr.bf16.mxu0 %v1258_v7  ;;  %1218 = vmatprep.subr.bf16.mxu1 %v1258_v7 }
  0x1c   : > { %1176 = vmatpush3.bf16.msra.mxu0 %v1258_v7  ;;  %1226 = vmatpush3.bf16.msra.mxu1 %v1258_v7 }
  0x1d   : > { %1177 = vmatprep.subr.bf16.mxu0 %v1259_v8  ;;  %1219 = vmatprep.subr.bf16.mxu1 %v1259_v8 }
  0x20   : > { %1178 = vmatpush3.bf16.msra.mxu0 %v1259_v8  ;;  %1227 = vmatpush3.bf16.msra.mxu1 %v1259_v8 }
  0x21   : > { %1179 = vmatprep.subr.bf16.mxu0 %v1260_v9  ;;  %1220 = vmatprep.subr.bf16.mxu1 %v1260_v9 }
  0x24   : > { %1180 = vmatpush3.bf16.msra.mxu0 %v1260_v9  ;;  %1228 = vmatpush3.bf16.msra.mxu1 %v1260_v9 }
  0x27   : > { %1182 = vmatmul.mubr.bf16.vlgmr.msra.gmra.mrb[0].mxu0 %v1263_v10  ;;  %1198 = vmatmul.mubr.bf16.vlgmr.msra.gmra.mrb[0].mxu1 %v1264_v11 }
  0x28   : > { %1185 = vmatprep.mubr.bf16.mxu0 %v1265_v12  ;;  %1201 = vmatprep.mubr.bf16.mxu1 %v1266_v13 }
  0x2f   : > { %1186 = vmatmul.mubr.bf16.gmra.mrb[4].mxu0 %v1267_v14  ;;  %1202 = vmatmul.mubr.bf16.gmra.mrb[4].mxu1 %v1268_v15 }
  0x30   : > { %1189 = vmatprep.mubr.bf16.mxu0 %v1269_v16  ;;  %1205 = vmatprep.mubr.bf16.mxu1 %v1270_v17 }
  0x37   : > { %1190 = vmatmul.mubr.bf16.gmra.mrb[8].mxu0 %v1271_v18  ;;  %1206 = vmatmul.mubr.bf16.gmra.mrb[8].mxu1 %v1272_v19 }
  0x38   : > { %1193 = vmatprep.mubr.bf16.mxu0 %v1273_v20  ;;  %1209 = vmatprep.mubr.bf16.mxu1 %v1274_v21 }
  0x3f   : > { %1194 = vmatmul.mubr.bf16.gmra.mrb[12].mxu0 %v1275_v22  ;;  %1210 = vmatmul.mubr.bf16.gmra.mrb[12].mxu1 %v1276_v23 }
  0xfa   : > { %v1183_v25 = vpop.f32.mrb[0].mxu0  ;;  %v1199_v26 = vpop.f32.mrb[0].mxu1 }
  0xfb   : > { %v468_v27 = vadd.f32 %v1183_v25, %v1392_v24  ;;  %v532_v28 = vadd.f32 %v1199_v26, %v1392_v24  ;;  %v459_v29 = vpop.f32.mrb[1].mxu0  ;;  %v523_v30 = vpop.f32.mrb[1].mxu1 }
  0xfc   : > { %v460_v31 = vadd.f32 %v1392_v24, %v459_v29  ;;  %v524_v32 = vadd.f32 %v1392_v24, %v523_v30  ;;  %v1184_v33 = vpop.f32.mrb[2].mxu0  ;;  %v1200_v34 = vpop.f32.mrb[2].mxu1 }
  0xfd   : > { %vm588_vm0 = vcmp.ge.f32.partialorder %v468_v27, 0.0  ;;  %v620_v35 = vmul.f32 0.2, %v468_v27  ;;  %vm604_vm1 = vcmp.ge.f32.partialorder %v532_v28, 0.0  ;;  %v636_v36 = vmul.f32 0.2, %v532_v28 }
  0xfe   : > { %vm586_vm2 = vcmp.ge.f32.partialorder %v460_v31, 0.0  ;;  %v618_v37 = vmul.f32 0.2, %v460_v31  ;;  %vm602_vm3 = vcmp.ge.f32.partialorder %v524_v32, 0.0  ;;  %v634_v38 = vmul.f32 0.2, %v524_v32 }
  0xff   : > { %v471_v39 = vadd.f32 %v1184_v33, %v1392_v24  ;;  %v535_v40 = vadd.f32 %v1200_v34, %v1392_v24  ;;  %v462_v41 = vpop.f32.mrb[3].mxu0  ;;  %v526_v42 = vpop.f32.mrb[3].mxu1  ;;  %v652_v43 = vsel %vm588_vm0, %v468_v27, %v620_v35  ;;  %v668_v44 = vsel %vm604_vm1, %v532_v28, %v636_v36 }
 0x100   : > { %v463_v45 = vadd.f32 %v1392_v24, %v462_v41  ;;  %v527_v46 = vadd.f32 %v1392_v24, %v526_v42  ;;  %v650_v51 = vsel %vm586_vm2, %v460_v31, %v618_v37  ;;  %v666_v52 = vsel %vm602_vm3, %v524_v32, %v634_v38 }
 0x101   : > { %vm589_vm4 = vcmp.ge.f32.partialorder %v471_v39, 0.0  ;;  %v621_v47 = vmul.f32 0.2, %v471_v39  ;;  %vm605_vm5 = vcmp.ge.f32.partialorder %v535_v40, 0.0  ;;  %v637_v48 = vmul.f32 0.2, %v535_v40 }
 0x102   : > { %vm587_vm6 = vcmp.ge.f32.partialorder %v463_v45, 0.0  ;;  %v619_v49 = vmul.f32 0.2, %v463_v45  ;;  %vm603_vm7 = vcmp.ge.f32.partialorder %v527_v46, 0.0  ;;  %v635_v50 = vmul.f32 0.2, %v527_v46 }
 0x103   : > { %v653_v53 = vsel %vm589_vm4, %v471_v39, %v621_v47  ;;  %v669_v54 = vsel %vm605_vm5, %v535_v40, %v637_v48  ;;  %v1187_v55 = vpop.f32.mrb[4].mxu0  ;;  %v1203_v56 = vpop.f32.mrb[4].mxu1 }
 0x104   : > { %v1054_v57 = vpack.c.bf16 %v653_v53, %v652_v43  ;;  %v1094_v58 = vpack.c.bf16 %v669_v54, %v668_v44  ;;  %v651_v59 = vsel %vm587_vm6, %v463_v45, %v619_v49  ;;  %v667_v60 = vsel %vm603_vm7, %v527_v46, %v635_v50  ;;  %v475_v61 = vpop.f32.mrb[5].mxu0  ;;  %v539_v62 = vpop.f32.mrb[5].mxu1 }
 0x105   : > { %v1049_v63 = vpack.c.bf16 %v651_v59, %v650_v51  ;;  %v1089_v0 = vpack.c.bf16 %v667_v60, %v666_v52  ;;  %v484_v1 = vadd.f32 %v1187_v55, %v1392_v24  ;;  %v548_v2 = vadd.f32 %v1203_v56, %v1392_v24  ;;  %v1188_v3 = vpop.f32.mrb[6].mxu0  ;;  %v1204_v4 = vpop.f32.mrb[6].mxu1 }
 0x106   : > { %1126 = vst [vmem:[%s1409_s17 + $0x8] sm:$0xff] %v1054_v57   ;;  %1134 = vst [vmem:[%s1409_s17 + $0x48] sm:$0xff] %v1094_v58   ;;  %v476_v5 = vadd.f32 %v1392_v24, %v475_v61  ;;  %v540_v6 = vadd.f32 %v1392_v24, %v539_v62  ;;  %v487_v7 = vadd.f32 %v1188_v3, %v1392_v24  ;;  %v478_v9 = vpop.f32.mrb[7].mxu0  ;;  %v542_v10 = vpop.f32.mrb[7].mxu1 }
 0x107   : > { %v551_v8 = vadd.f32 %v1204_v4, %v1392_v24  ;;  %1050 = vst [vmem:[%s1409_s17] sm:$0xff] %v1049_v63   ;;  %1133 = vst [vmem:[%s1409_s17 + $0x40] sm:$0xff] %v1089_v0   ;;  %vm592_vm8 = vcmp.ge.f32.partialorder %v484_v1, 0.0  ;;  %v624_v11 = vmul.f32 0.2, %v484_v1  ;;  %vm608_vm9 = vcmp.ge.f32.partialorder %v548_v2, 0.0 }
 0x108   : > { %v640_v12 = vmul.f32 0.2, %v548_v2  ;;  %vm590_vm10 = vcmp.ge.f32.partialorder %v476_v5, 0.0  ;;  %v622_v13 = vmul.f32 0.2, %v476_v5  ;;  %vm606_vm11 = vcmp.ge.f32.partialorder %v540_v6, 0.0 }
 0x109   : > { %v656_v14 = vsel %vm592_vm8, %v484_v1, %v624_v11  ;;  %v638_v15 = vmul.f32 0.2, %v540_v6  ;;  %vm593_vm12 = vcmp.ge.f32.partialorder %v487_v7, 0.0  ;;  %v625_v16 = vmul.f32 0.2, %v487_v7 }
 0x10a   : > { %v672_v17 = vsel %vm608_vm9, %v548_v2, %v640_v12  ;;  %v654_v18 = vsel %vm590_vm10, %v476_v5, %v622_v13  ;;  %vm609_vm13 = vcmp.ge.f32.partialorder %v551_v8, 0.0  ;;  %v641_v19 = vmul.f32 0.2, %v551_v8  ;;  %v1191_v20 = vpop.f32.mrb[8].mxu0  ;;  %v1207_v21 = vpop.f32.mrb[8].mxu1 }
 0x10b   : > { %v657_v22 = vsel %vm593_vm12, %v487_v7, %v625_v16  ;;  %v479_v23 = vadd.f32 %v1392_v24, %v478_v9  ;;  %v543_v25 = vadd.f32 %v1392_v24, %v542_v10  ;;  %v500_v26 = vadd.f32 %v1191_v20, %v1392_v24  ;;  %v491_v27 = vpop.f32.mrb[9].mxu0  ;;  %v555_v28 = vpop.f32.mrb[9].mxu1 }
 0x10c   : > { %v1064_v29 = vpack.c.bf16 %v657_v22, %v656_v14  ;;  %v673_v30 = vsel %vm609_vm13, %v551_v8, %v641_v19  ;;  %v564_v31 = vadd.f32 %v1207_v21, %v1392_v24  ;;  %v492_v32 = vadd.f32 %v1392_v24, %v491_v27  ;;  %v1192_v33 = vpop.f32.mrb[10].mxu0  ;;  %v1208_v34 = vpop.f32.mrb[10].mxu1 }
 0x10d   : > { %v1104_v35 = vpack.c.bf16 %v673_v30, %v672_v17  ;;  %vm591_vm14 = vcmp.ge.f32.partialorder %v479_v23, 0.0  ;;  %v623_v36 = vmul.f32 0.2, %v479_v23  ;;  %vm607_vm15 = vcmp.ge.f32.partialorder %v543_v25, 0.0  ;;  %v494_v37 = vpop.f32.mrb[11].mxu0  ;;  %v558_v38 = vpop.f32.mrb[11].mxu1 }
 0x10e   : > { %1128 = vst [vmem:[%s1409_s17 + $0x18] sm:$0xff] %v1064_v29   ;;  %v639_v39 = vmul.f32 0.2, %v543_v25  ;;  %vm596_vm0 = vcmp.ge.f32.partialorder %v500_v26, 0.0  ;;  %v628_v40 = vmul.f32 0.2, %v500_v26  ;;  %v670_v41 = vsel %vm606_vm11, %v540_v6, %v638_v15 }
 0x10f   : > { %vm612_vm1 = vcmp.ge.f32.partialorder %v564_v31, 0.0  ;;  %1136 = vst [vmem:[%s1409_s17 + $0x58] sm:$0xff] %v1104_v35   ;;  %v655_v42 = vsel %vm591_vm14, %v479_v23, %v623_v36  ;;  %v644_v43 = vmul.f32 0.2, %v564_v31  ;;  %vm594_vm2 = vcmp.ge.f32.partialorder %v492_v32, 0.0 }
 0x110   : > { %v1059_v44 = vpack.c.bf16 %v655_v42, %v654_v18  ;;  %v671_v45 = vsel %vm607_vm15, %v543_v25, %v639_v39  ;;  %v626_v46 = vmul.f32 0.2, %v492_v32  ;;  %v556_v47 = vadd.f32 %v1392_v24, %v555_v28 }
 0x111   : > { %v1099_v48 = vpack.c.bf16 %v671_v45, %v670_v41  ;;  %v660_v49 = vsel %vm596_vm0, %v500_v26, %v628_v40  ;;  %v676_v50 = vsel %vm612_vm1, %v564_v31, %v644_v43  ;;  %v503_v51 = vadd.f32 %v1192_v33, %v1392_v24 }
 0x112   : > { %1127 = vst [vmem:[%s1409_s17 + $0x10] sm:$0xff] %v1059_v44   ;;  %vm610_vm3 = vcmp.ge.f32.partialorder %v556_v47, 0.0  ;;  %v642_v52 = vmul.f32 0.2, %v556_v47  ;;  %v567_v53 = vadd.f32 %v1208_v34, %v1392_v24  ;;  %v495_v54 = vadd.f32 %v1392_v24, %v494_v37  ;;  %v1195_v55 = vpop.f32.mrb[12].mxu0  ;;  %v1211_v56 = vpop.f32.mrb[12].mxu1 }
 0x113   : > { %1135 = vst [vmem:[%s1409_s17 + $0x50] sm:$0xff] %v1099_v48   ;;  %vm597_vm4 = vcmp.ge.f32.partialorder %v503_v51, 0.0  ;;  %v629_v57 = vmul.f32 0.2, %v503_v51  ;;  %v559_v58 = vadd.f32 %v1392_v24, %v558_v38  ;;  %v516_v59 = vadd.f32 %v1195_v55, %v1392_v24  ;;  %v507_v60 = vpop.f32.mrb[13].mxu0  ;;  %v571_v61 = vpop.f32.mrb[13].mxu1 }
 0x114   : > { %v658_v62 = vsel %vm594_vm2, %v492_v32, %v626_v46  ;;  %vm613_vm5 = vcmp.ge.f32.partialorder %v567_v53, 0.0  ;;  %v645_v63 = vmul.f32 0.2, %v567_v53  ;;  %vm595_vm6 = vcmp.ge.f32.partialorder %v495_v54, 0.0  ;;  %v1196_v0 = vpop.f32.mrb[14].mxu0  ;;  %v1212_v1 = vpop.f32.mrb[14].mxu1 }
 0x115   : > { %v661_v2 = vsel %vm597_vm4, %v503_v51, %v629_v57  ;;  %v627_v3 = vmul.f32 0.2, %v495_v54  ;;  %vm611_vm7 = vcmp.ge.f32.partialorder %v559_v58, 0.0  ;;  %v643_v4 = vmul.f32 0.2, %v559_v58  ;;  %v510_v5 = vpop.f32.mrb[15].mxu0 }
 0x116   : > { %v674_v6 = vsel %vm610_vm3, %v556_v47, %v642_v52  ;;  %v1074_v7 = vpack.c.bf16 %v661_v2, %v660_v49  ;;  %v677_v8 = vsel %vm613_vm5, %v567_v53, %v645_v63  ;;  %v632_v9 = vmul.f32 0.2, %v516_v59  ;;  %v574_v10 = vpop.f32.mrb[15].mxu1 }
 0x117   : > { %v1114_v11 = vpack.c.bf16 %v677_v8, %v676_v50  ;;  %v659_v12 = vsel %vm595_vm6, %v495_v54, %v627_v3  ;;  %v675_v13 = vsel %vm611_vm7, %v559_v58, %v643_v4  ;;  %v580_v14 = vadd.f32 %v1211_v56, %v1392_v24 }
 0x118   : > { %1130 = vst [vmem:[%s1409_s17 + $0x28] sm:$0xff] %v1074_v7   ;;  %v1069_v15 = vpack.c.bf16 %v659_v12, %v658_v62  ;;  %v1109_v16 = vpack.c.bf16 %v675_v13, %v674_v6  ;;  %vm600_vm8 = vcmp.ge.f32.partialorder %v516_v59, 0.0  ;;  %v508_v17 = vadd.f32 %v1392_v24, %v507_v60 }
 0x119   : > { %1138 = vst [vmem:[%s1409_s17 + $0x68] sm:$0xff] %v1114_v11   ;;  %vm616_vm9 = vcmp.ge.f32.partialorder %v580_v14, 0.0  ;;  %v648_v18 = vmul.f32 0.2, %v580_v14  ;;  %v572_v19 = vadd.f32 %v1392_v24, %v571_v61  ;;  %v519_v20 = vadd.f32 %v1196_v0, %v1392_v24 }
 0x11a   : > { %1129 = vst [vmem:[%s1409_s17 + $0x20] sm:$0xff] %v1069_v15   ;;  %1137 = vst [vmem:[%s1409_s17 + $0x60] sm:$0xff] %v1109_v16   ;;  %v630_v21 = vmul.f32 0.2, %v508_v17  ;;  %v583_v22 = vadd.f32 %v1212_v1, %v1392_v24  ;;  %v511_v23 = vadd.f32 %v1392_v24, %v510_v5  ;;  %v664_v25 = vsel %vm600_vm8, %v516_v59, %v632_v9 }
 0x11b   : > { %vm598_vm10 = vcmp.ge.f32.partialorder %v508_v17, 0.0  ;;  %vm601_vm11 = vcmp.ge.f32.partialorder %v519_v20, 0.0  ;;  %v680_v26 = vsel %vm616_vm9, %v580_v14, %v648_v18  ;;  %v633_v27 = vmul.f32 0.2, %v519_v20 }
 0x11c   : > { %vm617_vm12 = vcmp.ge.f32.partialorder %v583_v22, 0.0  ;;  %v649_v28 = vmul.f32 0.2, %v583_v22  ;;  %vm614_vm13 = vcmp.ge.f32.partialorder %v572_v19, 0.0  ;;  %vm599_vm14 = vcmp.ge.f32.partialorder %v511_v23, 0.0 }
 0x11d   : > { %v631_v29 = vmul.f32 0.2, %v511_v23  ;;  %v575_v30 = vadd.f32 %v1392_v24, %v574_v10  ;;  %v662_v31 = vsel %vm598_vm10, %v508_v17, %v630_v21  ;;  %v646_v32 = vmul.f32 0.2, %v572_v19 }
 0x11e   : > { %v665_v33 = vsel %vm601_vm11, %v519_v20, %v633_v27  ;;  %v681_v34 = vsel %vm617_vm12, %v583_v22, %v649_v28 }
 0x11f   : > { %v1084_v35 = vpack.c.bf16 %v665_v33, %v664_v25  ;;  %v1124_v36 = vpack.c.bf16 %v681_v34, %v680_v26  ;;  %v663_v37 = vsel %vm599_vm14, %v511_v23, %v631_v29  ;;  %vm615_vm15 = vcmp.ge.f32.partialorder %v575_v30, 0.0 }
 0x120   : > { %v1079_v38 = vpack.c.bf16 %v663_v37, %v662_v31  ;;  %v647_v39 = vmul.f32 0.2, %v575_v30  ;;  %v678_v40 = vsel %vm614_vm13, %v572_v19, %v646_v32 }
 0x121   : > { %1132 = vst [vmem:[%s1409_s17 + $0x38] sm:$0xff] %v1084_v35   ;;  %1140 = vst [vmem:[%s1409_s17 + $0x78] sm:$0xff] %v1124_v36  }
 0x122   : > { %1131 = vst [vmem:[%s1409_s17 + $0x30] sm:$0xff] %v1079_v38   ;;  %v679_v41 = vsel %vm615_vm15, %v575_v30, %v647_v39 }
 0x123   : > { %v1119_v42 = vpack.c.bf16 %v679_v41, %v678_v40 }
 0x125   : > { %1139 = vst [vmem:[%s1409_s17 + $0x70] sm:$0xff] %v1119_v42  }
 0x126 PF: > { %s13_s14 = sadd.s32 1, %s1299_s14   ;;  %s1468_s12 = smov %s1295_s13 }
 0x127   : > { %p10_p5 = scmp.ge.s32.totalorder %s13_s14, 4   ;;  %s1469_s13 = smov %s1471_s15 }
 0x129   :  { %12 = sbr.rel (!%p10_p5) target bundleno = 2 (0x2), region = 68 }

// kernel: fc_discriminator.6
= control target key start
LH: loop header
LB: loop body
LE: loop exit
PB: predicated region body
PF: predicated region fallthrough
CT: control target
= control target key end

     0   :  { %s672_s1 = inlined_call_operand.vmem [shape: bf16[128,128], index: 1, kind: input, shape index: {}]   ;;  %s673_s0 = inlined_call_operand.vmem [shape: bf16[128,128], index: 0, kind: input, shape index: {}]   ;;  %s674_s2 = inlined_call_operand.vmem [shape: f32[1,128], index: 2, kind: input, shape index: {}]   ;;  %s675_s3 = inlined_call_operand.vmem [shape: bf16[128,128], index: 3, kind: output, shape index: {}]  }
   0x1   :  { %v539_v0 = vld [vmem:[%s672_s1] sm:$0xff]   ;;  %v540_v1 = vld [vmem:[%s672_s1 + $0x8] sm:$0xff]   ;;  %v541_v2 = vld [vmem:[%s672_s1 + $0x10] sm:$0xff]  }
   0x2   :  { %491 = vmatprep.subr.bf16.mxu0 %v539_v0  ;;  %523 = vmatprep.subr.bf16.mxu1 %v539_v0  ;;  %v542_v3 = vld [vmem:[%s672_s1 + $0x18] sm:$0xff]   ;;  %v547_v4 = vld [vmem:[%s673_s0] sm:$0xff]   ;;  %v544_v7 = vld [vmem:[%s672_s1 + $0x28] sm:$0xff]  }
   0x3   :  { %492 = vmatpush3.bf16.msra.mxu0 %v539_v0  ;;  %531 = vmatpush3.bf16.msra.mxu1 %v539_v0  ;;  %v548_v5 = vld [vmem:[%s673_s0 + $0x20] sm:$0xff]   ;;  %v545_v8 = vld [vmem:[%s672_s1 + $0x30] sm:$0xff]   ;;  %v546_v9 = vld [vmem:[%s672_s1 + $0x38] sm:$0xff]  }
   0x4   :  { %493 = vmatprep.subr.bf16.mxu0 %v540_v1  ;;  %524 = vmatprep.subr.bf16.mxu1 %v540_v1  ;;  %v543_v6 = vld [vmem:[%s672_s1 + $0x20] sm:$0xff]   ;;  %v549_v10 = vld [vmem:[%s673_s0 + $0x8] sm:$0xff]   ;;  %v551_v12 = vld [vmem:[%s673_s0 + $0x10] sm:$0xff]  }
   0x5   :  { %507 = vmatprep.mubr.bf16.mxu0 %v547_v4  ;;  %515 = vmatprep.mubr.bf16.mxu1 %v548_v5  ;;  %v550_v11 = vld [vmem:[%s673_s0 + $0x28] sm:$0xff]   ;;  %v552_v13 = vld [vmem:[%s673_s0 + $0x30] sm:$0xff]   ;;  %v553_v14 = vld [vmem:[%s673_s0 + $0x18] sm:$0xff]  }
   0x6   :  { %v554_v15 = vld [vmem:[%s673_s0 + $0x38] sm:$0xff]   ;;  %v626_v16 = vld [vmem:[%s674_s2] ss:$0 sm:$0xff] }
   0x7   :  { %494 = vmatpush3.bf16.msra.mxu0 %v540_v1  ;;  %532 = vmatpush3.bf16.msra.mxu1 %v540_v1 }
   0x8   :  { %495 = vmatprep.subr.bf16.mxu0 %v541_v2  ;;  %525 = vmatprep.subr.bf16.mxu1 %v541_v2 }
   0xb   :  { %496 = vmatpush3.bf16.msra.mxu0 %v541_v2  ;;  %533 = vmatpush3.bf16.msra.mxu1 %v541_v2 }
   0xc   :  { %497 = vmatprep.subr.bf16.mxu0 %v542_v3  ;;  %526 = vmatprep.subr.bf16.mxu1 %v542_v3 }
   0xf   :  { %498 = vmatpush3.bf16.msra.mxu0 %v542_v3  ;;  %534 = vmatpush3.bf16.msra.mxu1 %v542_v3 }
  0x10   :  { %499 = vmatprep.subr.bf16.mxu0 %v543_v6  ;;  %527 = vmatprep.subr.bf16.mxu1 %v543_v6 }
  0x13   :  { %500 = vmatpush3.bf16.msra.mxu0 %v543_v6  ;;  %535 = vmatpush3.bf16.msra.mxu1 %v543_v6 }
  0x14   :  { %501 = vmatprep.subr.bf16.mxu0 %v544_v7  ;;  %528 = vmatprep.subr.bf16.mxu1 %v544_v7 }
  0x17   :  { %502 = vmatpush3.bf16.msra.mxu0 %v544_v7  ;;  %536 = vmatpush3.bf16.msra.mxu1 %v544_v7 }
  0x18   :  { %503 = vmatprep.subr.bf16.mxu0 %v545_v8  ;;  %529 = vmatprep.subr.bf16.mxu1 %v545_v8 }
  0x1b   :  { %504 = vmatpush3.bf16.msra.mxu0 %v545_v8  ;;  %537 = vmatpush3.bf16.msra.mxu1 %v545_v8 }
  0x1c   :  { %505 = vmatprep.subr.bf16.mxu0 %v546_v9  ;;  %530 = vmatprep.subr.bf16.mxu1 %v546_v9 }
  0x1f   :  { %506 = vmatpush3.bf16.msra.mxu0 %v546_v9  ;;  %538 = vmatpush3.bf16.msra.mxu1 %v546_v9 }
  0x22   :  { %508 = vmatmul.mubr.bf16.vlgmr.msra.gmra.mrb[0].mxu0 %v549_v10  ;;  %516 = vmatmul.mubr.bf16.vlgmr.msra.gmra.mrb[0].mxu1 %v550_v11 }
  0x23   :  { %511 = vmatprep.mubr.bf16.mxu0 %v551_v12  ;;  %519 = vmatprep.mubr.bf16.mxu1 %v552_v13 }
  0x2a   :  { %512 = vmatmul.mubr.bf16.gmra.mrb[4].mxu0 %v553_v14  ;;  %520 = vmatmul.mubr.bf16.gmra.mrb[4].mxu1 %v554_v15 }
  0xf5   :  { %v509_v17 = vpop.f32.mrb[0].mxu0  ;;  %v517_v18 = vpop.f32.mrb[0].mxu1 }
  0xf6   :  { %v193_v19 = vadd.f32 %v509_v17, %v626_v16  ;;  %v225_v20 = vadd.f32 %v517_v18, %v626_v16  ;;  %v184_v21 = vpop.f32.mrb[1].mxu0  ;;  %v216_v22 = vpop.f32.mrb[1].mxu1 }
  0xf7   :  { %v185_v23 = vadd.f32 %v626_v16, %v184_v21  ;;  %v217_v24 = vadd.f32 %v626_v16, %v216_v22  ;;  %v510_v25 = vpop.f32.mrb[2].mxu0  ;;  %v518_v26 = vpop.f32.mrb[2].mxu1 }
  0xf8   :  { %vm249_vm0 = vcmp.ge.f32.partialorder %v193_v19, 0.0  ;;  %v265_v27 = vmul.f32 0.2, %v193_v19  ;;  %vm257_vm1 = vcmp.ge.f32.partialorder %v225_v20, 0.0  ;;  %v273_v28 = vmul.f32 0.2, %v225_v20 }
  0xf9   :  { %vm247_vm2 = vcmp.ge.f32.partialorder %v185_v23, 0.0  ;;  %v263_v29 = vmul.f32 0.2, %v185_v23  ;;  %vm255_vm3 = vcmp.ge.f32.partialorder %v217_v24, 0.0  ;;  %v271_v30 = vmul.f32 0.2, %v217_v24 }
  0xfa   :  { %v196_v31 = vadd.f32 %v510_v25, %v626_v16  ;;  %v228_v32 = vadd.f32 %v518_v26, %v626_v16  ;;  %v187_v33 = vpop.f32.mrb[3].mxu0  ;;  %v219_v34 = vpop.f32.mrb[3].mxu1  ;;  %v281_v35 = vsel %vm249_vm0, %v193_v19, %v265_v27  ;;  %v289_v36 = vsel %vm257_vm1, %v225_v20, %v273_v28 }
  0xfb   :  { %v188_v37 = vadd.f32 %v626_v16, %v187_v33  ;;  %v220_v38 = vadd.f32 %v626_v16, %v219_v34  ;;  %v279_v43 = vsel %vm247_vm2, %v185_v23, %v263_v29  ;;  %v287_v44 = vsel %vm255_vm3, %v217_v24, %v271_v30 }
  0xfc   :  { %vm250_vm4 = vcmp.ge.f32.partialorder %v196_v31, 0.0  ;;  %v266_v39 = vmul.f32 0.2, %v196_v31  ;;  %vm258_vm5 = vcmp.ge.f32.partialorder %v228_v32, 0.0  ;;  %v274_v40 = vmul.f32 0.2, %v228_v32 }
  0xfd   :  { %vm248_vm6 = vcmp.ge.f32.partialorder %v188_v37, 0.0  ;;  %v264_v41 = vmul.f32 0.2, %v188_v37  ;;  %vm256_vm7 = vcmp.ge.f32.partialorder %v220_v38, 0.0  ;;  %v272_v42 = vmul.f32 0.2, %v220_v38 }
  0xfe   :  { %v282_v45 = vsel %vm250_vm4, %v196_v31, %v266_v39  ;;  %v290_v46 = vsel %vm258_vm5, %v228_v32, %v274_v40  ;;  %v513_v47 = vpop.f32.mrb[4].mxu0  ;;  %v521_v48 = vpop.f32.mrb[4].mxu1 }
  0xff   :  { %v436_v49 = vpack.c.bf16 %v282_v45, %v281_v35  ;;  %v456_v50 = vpack.c.bf16 %v290_v46, %v289_v36  ;;  %v280_v51 = vsel %vm248_vm6, %v188_v37, %v264_v41  ;;  %v288_v52 = vsel %vm256_vm7, %v220_v38, %v272_v42  ;;  %v200_v53 = vpop.f32.mrb[5].mxu0  ;;  %v232_v54 = vpop.f32.mrb[5].mxu1 }
 0x100   :  { %v431_v55 = vpack.c.bf16 %v280_v51, %v279_v43  ;;  %v451_v56 = vpack.c.bf16 %v288_v52, %v287_v44  ;;  %v209_v57 = vadd.f32 %v513_v47, %v626_v16  ;;  %v241_v58 = vadd.f32 %v521_v48, %v626_v16  ;;  %v514_v59 = vpop.f32.mrb[6].mxu0  ;;  %v522_v60 = vpop.f32.mrb[6].mxu1 }
 0x101   :  { %468 = vst [vmem:[%s675_s3 + $0x8] sm:$0xff] %v436_v49   ;;  %472 = vst [vmem:[%s675_s3 + $0x28] sm:$0xff] %v456_v50   ;;  %v201_v61 = vadd.f32 %v626_v16, %v200_v53  ;;  %v233_v62 = vadd.f32 %v626_v16, %v232_v54  ;;  %v212_v63 = vadd.f32 %v514_v59, %v626_v16  ;;  %v203_v1 = vpop.f32.mrb[7].mxu0  ;;  %v235_v2 = vpop.f32.mrb[7].mxu1 }
 0x102   :  { %v244_v0 = vadd.f32 %v522_v60, %v626_v16  ;;  %432 = vst [vmem:[%s675_s3] sm:$0xff] %v431_v55   ;;  %471 = vst [vmem:[%s675_s3 + $0x20] sm:$0xff] %v451_v56   ;;  %v269_v3 = vmul.f32 0.2, %v209_v57  ;;  %vm253_vm8 = vcmp.ge.f32.partialorder %v209_v57, 0.0  ;;  %v277_v4 = vmul.f32 0.2, %v241_v58 }
 0x103   :  { %vm261_vm9 = vcmp.ge.f32.partialorder %v241_v58, 0.0  ;;  %vm251_vm10 = vcmp.ge.f32.partialorder %v201_v61, 0.0  ;;  %vm254_vm11 = vcmp.ge.f32.partialorder %v212_v63, 0.0  ;;  %v270_v5 = vmul.f32 0.2, %v212_v63 }
 0x104   :  { %v267_v6 = vmul.f32 0.2, %v201_v61  ;;  %vm259_vm12 = vcmp.ge.f32.partialorder %v233_v62, 0.0  ;;  %vm262_vm13 = vcmp.ge.f32.partialorder %v244_v0, 0.0  ;;  %v278_v7 = vmul.f32 0.2, %v244_v0 }
 0x105   :  { %v285_v8 = vsel %vm253_vm8, %v209_v57, %v269_v3  ;;  %v286_v9 = vsel %vm254_vm11, %v212_v63, %v270_v5  ;;  %v204_v10 = vadd.f32 %v626_v16, %v203_v1  ;;  %v236_v11 = vadd.f32 %v626_v16, %v235_v2 }
 0x106   :  { %v293_v12 = vsel %vm261_vm9, %v241_v58, %v277_v4  ;;  %v275_v13 = vmul.f32 0.2, %v233_v62  ;;  %v446_v14 = vpack.c.bf16 %v286_v9, %v285_v8  ;;  %v294_v15 = vsel %vm262_vm13, %v244_v0, %v278_v7 }
 0x107   :  { %v466_v17 = vpack.c.bf16 %v294_v15, %v293_v12  ;;  %vm252_vm14 = vcmp.ge.f32.partialorder %v204_v10, 0.0  ;;  %v268_v18 = vmul.f32 0.2, %v204_v10  ;;  %vm260_vm15 = vcmp.ge.f32.partialorder %v236_v11, 0.0 }
 0x108   :  { %470 = vst [vmem:[%s675_s3 + $0x18] sm:$0xff] %v446_v14   ;;  %v276_v19 = vmul.f32 0.2, %v236_v11  ;;  %v283_v20 = vsel %vm251_vm10, %v201_v61, %v267_v6  ;;  %v291_v21 = vsel %vm259_vm12, %v233_v62, %v275_v13 }
 0x109   :  { %474 = vst [vmem:[%s675_s3 + $0x38] sm:$0xff] %v466_v17   ;;  %v284_v16 = vsel %vm252_vm14, %v204_v10, %v268_v18 }
 0x10a   :  { %v441_v22 = vpack.c.bf16 %v284_v16, %v283_v20  ;;  %v292_v23 = vsel %vm260_vm15, %v236_v11, %v276_v19 }
 0x10b   :  { %v461_v24 = vpack.c.bf16 %v292_v23, %v291_v21 }
 0x10c   :  { %469 = vst [vmem:[%s675_s3 + $0x10] sm:$0xff] %v441_v22  }
 0x10d   :  { %473 = vst [vmem:[%s675_s3 + $0x30] sm:$0xff] %v461_v24  }

// kernel: fc_discriminator.7
= control target key start
LH: loop header
LB: loop body
LE: loop exit
PB: predicated region body
PF: predicated region fallthrough
CT: control target
= control target key end

     0   :  { %s868_s1 = inlined_call_operand.vmem [shape: bf16[256,128], index: 1, kind: input, shape index: {}]   ;;  %s869_s0 = inlined_call_operand.vmem [shape: bf16[128,256], index: 0, kind: input, shape index: {}]   ;;  %s870_s2 = inlined_call_operand.vmem [shape: f32[1,128], index: 2, kind: input, shape index: {}]   ;;  %s871_s3 = inlined_call_operand.vmem [shape: bf16[128,128], index: 3, kind: output, shape index: {}]  }
   0x1   :  { %v667_v0 = vld [vmem:[%s868_s1 + $0x40] sm:$0xff]   ;;  %v669_v2 = vld [vmem:[%s868_s1 + $0x48] sm:$0xff]   ;;  %v671_v4 = vld [vmem:[%s868_s1 + $0x50] sm:$0xff]  }
   0x2   :  { %v668_v1 = vld [vmem:[%s868_s1] sm:$0xff]   ;;  %587 = vmatprep.subr.bf16.mxu0 %v667_v0  ;;  %651 = vmatprep.subr.bf16.mxu1 %v667_v0  ;;  %v670_v3 = vld [vmem:[%s868_s1 + $0x8] sm:$0xff]   ;;  %v672_v5 = vld [vmem:[%s868_s1 + $0x10] sm:$0xff]  }
   0x3   :  { %588 = vmatpush3.bf16.msra.mxu0 %v668_v1  ;;  %659 = vmatpush3.bf16.msra.mxu1 %v668_v1  ;;  %v673_v6 = vld [vmem:[%s868_s1 + $0x58] sm:$0xff]   ;;  %v675_v8 = vld [vmem:[%s868_s1 + $0x60] sm:$0xff]   ;;  %v677_v10 = vld [vmem:[%s868_s1 + $0x68] sm:$0xff]  }
   0x4   :  { %589 = vmatprep.subr.bf16.mxu0 %v669_v2  ;;  %652 = vmatprep.subr.bf16.mxu1 %v669_v2  ;;  %v674_v7 = vld [vmem:[%s868_s1 + $0x18] sm:$0xff]   ;;  %v676_v9 = vld [vmem:[%s868_s1 + $0x20] sm:$0xff]   ;;  %v678_v13 = vld [vmem:[%s868_s1 + $0x28] sm:$0xff]  }
   0x5   :  { %v685_v11 = vld [vmem:[%s869_s0 + $0x4] ss:$8 sps:$4 sm:$0xff]   ;;  %v679_v14 = vld [vmem:[%s868_s1 + $0x70] sm:$0xff]   ;;  %v681_v16 = vld [vmem:[%s868_s1 + $0x78] sm:$0xff]  }
   0x6   :  { %v688_v12 = vld [vmem:[%s869_s0 + $0x44] ss:$8 sps:$4 sm:$0xff]   ;;  %278 = vmatprep.mubr.bf16.mxu0 %v685_v11  ;;  %v680_v15 = vld [vmem:[%s868_s1 + $0x30] sm:$0xff]   ;;  %v682_v17 = vld [vmem:[%s868_s1 + $0x38] sm:$0xff]  }
   0x7   :  { %590 = vmatpush3.bf16.msra.mxu0 %v670_v3  ;;  %660 = vmatpush3.bf16.msra.mxu1 %v670_v3  ;;  %v683_v18 = vld [vmem:[%s869_s0] ss:$8 sps:$4 sm:$0xff]   ;;  %v689_v20 = vld [vmem:[%s869_s0 + $0x14] ss:$8 sps:$4 sm:$0xff]   ;;  %v693_v22 = vld [vmem:[%s869_s0 + $0x10] ss:$8 sps:$4 sm:$0xff]  }
   0x8   :  { %591 = vmatprep.subr.bf16.mxu0 %v671_v4  ;;  %653 = vmatprep.subr.bf16.mxu1 %v671_v4  ;;  %v686_v19 = vld [vmem:[%s869_s0 + $0x40] ss:$8 sps:$4 sm:$0xff]   ;;  %v691_v21 = vld [vmem:[%s869_s0 + $0x54] ss:$8 sps:$4 sm:$0xff]   ;;  %v694_v23 = vld [vmem:[%s869_s0 + $0x50] ss:$8 sps:$4 sm:$0xff]  }
   0x9   :  { %310 = vmatprep.mubr.bf16.mxu1 %v688_v12  ;;  %v695_v24 = vld [vmem:[%s869_s0 + $0x24] ss:$8 sps:$4 sm:$0xff]   ;;  %v699_v26 = vld [vmem:[%s869_s0 + $0x20] ss:$8 sps:$4 sm:$0xff]   ;;  %v701_v28 = vld [vmem:[%s869_s0 + $0x34] ss:$8 sps:$4 sm:$0xff]  }
   0xa   :  { %v697_v25 = vld [vmem:[%s869_s0 + $0x64] ss:$8 sps:$4 sm:$0xff]   ;;  %v700_v27 = vld [vmem:[%s869_s0 + $0x60] ss:$8 sps:$4 sm:$0xff]   ;;  %v703_v29 = vld [vmem:[%s869_s0 + $0x74] ss:$8 sps:$4 sm:$0xff]  }
   0xb   :  { %592 = vmatpush3.bf16.msra.mxu0 %v672_v5  ;;  %661 = vmatpush3.bf16.msra.mxu1 %v672_v5  ;;  %v705_v30 = vld [vmem:[%s869_s0 + $0x30] ss:$8 sps:$4 sm:$0xff]   ;;  %v826_v34 = vld [vmem:[%s870_s2] ss:$0 sm:$0xff] }
   0xc   :  { %593 = vmatprep.subr.bf16.mxu0 %v673_v6  ;;  %654 = vmatprep.subr.bf16.mxu1 %v673_v6  ;;  %v706_v31 = vld [vmem:[%s869_s0 + $0x70] ss:$8 sps:$4 sm:$0xff]  }
   0xf   :  { %594 = vmatpush3.bf16.msra.mxu0 %v674_v7  ;;  %662 = vmatpush3.bf16.msra.mxu1 %v674_v7 }
  0x10   :  { %595 = vmatprep.subr.bf16.mxu0 %v675_v8  ;;  %655 = vmatprep.subr.bf16.mxu1 %v675_v8 }
  0x13   :  { %596 = vmatpush3.bf16.msra.mxu0 %v676_v9  ;;  %663 = vmatpush3.bf16.msra.mxu1 %v676_v9 }
  0x14   :  { %597 = vmatprep.subr.bf16.mxu0 %v677_v10  ;;  %656 = vmatprep.subr.bf16.mxu1 %v677_v10 }
  0x17   :  { %598 = vmatpush3.bf16.msra.mxu0 %v678_v13  ;;  %664 = vmatpush3.bf16.msra.mxu1 %v678_v13 }
  0x18   :  { %599 = vmatprep.subr.bf16.mxu0 %v679_v14  ;;  %657 = vmatprep.subr.bf16.mxu1 %v679_v14 }
  0x1b   :  { %600 = vmatpush3.bf16.msra.mxu0 %v680_v15  ;;  %665 = vmatpush3.bf16.msra.mxu1 %v680_v15 }
  0x1c   :  { %601 = vmatprep.subr.bf16.mxu0 %v681_v16  ;;  %658 = vmatprep.subr.bf16.mxu1 %v681_v16 }
  0x1f   :  { %602 = vmatpush3.bf16.msra.mxu0 %v682_v17  ;;  %666 = vmatpush3.bf16.msra.mxu1 %v682_v17 }
  0x22   :  { %279 = vmatmul.mubr.bf16.vlgmr.msra.gmra.mrb[0].mxu0 %v683_v18  ;;  %311 = vmatmul.mubr.bf16.vlgmr.msra.gmra.mrb[0].mxu1 %v686_v19 }
  0x23   :  { %286 = vmatprep.mubr.bf16.mxu0 %v689_v20  ;;  %318 = vmatprep.mubr.bf16.mxu1 %v691_v21 }
  0x2a   :  { %287 = vmatmul.mubr.bf16.gmra.mrb[4].mxu0 %v693_v22  ;;  %319 = vmatmul.mubr.bf16.gmra.mrb[4].mxu1 %v694_v23 }
  0x2b   :  { %294 = vmatprep.mubr.bf16.mxu0 %v695_v24  ;;  %326 = vmatprep.mubr.bf16.mxu1 %v697_v25 }
  0x32   :  { %295 = vmatmul.mubr.bf16.gmra.mrb[8].mxu0 %v699_v26  ;;  %327 = vmatmul.mubr.bf16.gmra.mrb[8].mxu1 %v700_v27 }
  0x33   :  { %302 = vmatprep.mubr.bf16.mxu0 %v701_v28  ;;  %334 = vmatprep.mubr.bf16.mxu1 %v703_v29 }
  0x3a   :  { %303 = vmatmul.mubr.bf16.gmra.mrb[12].mxu0 %v705_v30  ;;  %335 = vmatmul.mubr.bf16.gmra.mrb[12].mxu1 %v706_v31 }
  0xf5   :  { %v603_v32 = vpop.f32.mrb[0].mxu0  ;;  %v627_v33 = vpop.f32.mrb[0].mxu1 }
  0xf6   :  { %v604_v35 = vpop.f32.mrb[1].mxu0  ;;  %v628_v36 = vpop.f32.mrb[1].mxu1 }
  0xf7   :  { %v605_v37 = vadd.f32 %v604_v35, %v603_v32  ;;  %v629_v38 = vadd.f32 %v628_v36, %v627_v33  ;;  %v606_v39 = vpop.f32.mrb[2].mxu0  ;;  %v630_v40 = vpop.f32.mrb[2].mxu1 }
  0xf8   :  { %v607_v41 = vpop.f32.mrb[3].mxu0  ;;  %v631_v42 = vpop.f32.mrb[3].mxu1 }
  0xf9   :  { %v281_v43 = vadd.f32 %v605_v37, %v826_v34  ;;  %v313_v44 = vadd.f32 %v629_v38, %v826_v34  ;;  %v608_v45 = vadd.f32 %v607_v41, %v606_v39  ;;  %v632_v46 = vadd.f32 %v631_v42, %v630_v40 }
  0xfb   :  { %v359_v47 = vmul.f32 0.2, %v281_v43  ;;  %v367_v48 = vmul.f32 0.2, %v313_v44  ;;  %vm343_vm0 = vcmp.ge.f32.partialorder %v281_v43, 0.0  ;;  %vm351_vm1 = vcmp.ge.f32.partialorder %v313_v44, 0.0 }
  0xfc   :  { %v284_v49 = vadd.f32 %v608_v45, %v826_v34  ;;  %v316_v50 = vadd.f32 %v632_v46, %v826_v34 }
  0xfd   :  { %v609_v51 = vpop.f32.mrb[4].mxu0  ;;  %v633_v52 = vpop.f32.mrb[4].mxu1  ;;  %v375_v55 = vsel %vm343_vm0, %v281_v43, %v359_v47  ;;  %v383_v56 = vsel %vm351_vm1, %v313_v44, %v367_v48 }
  0xfe   :  { %vm344_vm2 = vcmp.ge.f32.partialorder %v284_v49, 0.0  ;;  %v360_v53 = vmul.f32 0.2, %v284_v49  ;;  %vm352_vm3 = vcmp.ge.f32.partialorder %v316_v50, 0.0  ;;  %v368_v54 = vmul.f32 0.2, %v316_v50 }
  0xff   :  { %v610_v57 = vpop.f32.mrb[5].mxu0  ;;  %v634_v58 = vpop.f32.mrb[5].mxu1 }
 0x100   :  { %v376_v59 = vsel %vm344_vm2, %v284_v49, %v360_v53  ;;  %v384_v60 = vsel %vm352_vm3, %v316_v50, %v368_v54  ;;  %v611_v61 = vadd.f32 %v610_v57, %v609_v51  ;;  %v635_v62 = vadd.f32 %v634_v58, %v633_v52  ;;  %v612_v63 = vpop.f32.mrb[6].mxu0  ;;  %v636_v0 = vpop.f32.mrb[6].mxu1 }
 0x101   :  { %v543_v1 = vpack.c.bf16 %v376_v59, %v375_v55  ;;  %v563_v2 = vpack.c.bf16 %v384_v60, %v383_v56  ;;  %v613_v3 = vpop.f32.mrb[7].mxu0  ;;  %v637_v4 = vpop.f32.mrb[7].mxu1 }
 0x102   :  { %v289_v5 = vadd.f32 %v611_v61, %v826_v34  ;;  %v321_v6 = vadd.f32 %v635_v62, %v826_v34  ;;  %v614_v7 = vadd.f32 %v613_v3, %v612_v63  ;;  %v638_v8 = vadd.f32 %v637_v4, %v636_v0 }
 0x103   :  { %544 = vst [vmem:[%s871_s3] sm:$0xff] %v543_v1   ;;  %583 = vst [vmem:[%s871_s3 + $0x20] sm:$0xff] %v563_v2  }
 0x104   :  { %v361_v9 = vmul.f32 0.2, %v289_v5  ;;  %v369_v10 = vmul.f32 0.2, %v321_v6  ;;  %v292_v11 = vadd.f32 %v614_v7, %v826_v34  ;;  %v324_v12 = vadd.f32 %v638_v8, %v826_v34 }
 0x105   :  { %v615_v13 = vpop.f32.mrb[8].mxu0  ;;  %v639_v14 = vpop.f32.mrb[8].mxu1  ;;  %vm345_vm4 = vcmp.ge.f32.partialorder %v289_v5, 0.0  ;;  %vm353_vm5 = vcmp.ge.f32.partialorder %v321_v6, 0.0 }
 0x106   :  { %v616_v15 = vpop.f32.mrb[9].mxu0  ;;  %v640_v16 = vpop.f32.mrb[9].mxu1  ;;  %vm346_vm6 = vcmp.ge.f32.partialorder %v292_v11, 0.0  ;;  %v362_v17 = vmul.f32 0.2, %v292_v11  ;;  %vm354_vm7 = vcmp.ge.f32.partialorder %v324_v12, 0.0  ;;  %v377_v23 = vsel %vm345_vm4, %v289_v5, %v361_v9 }
 0x107   :  { %v370_v18 = vmul.f32 0.2, %v324_v12  ;;  %v617_v19 = vadd.f32 %v616_v15, %v615_v13  ;;  %v641_v20 = vadd.f32 %v640_v16, %v639_v14  ;;  %v618_v21 = vpop.f32.mrb[10].mxu0  ;;  %v642_v22 = vpop.f32.mrb[10].mxu1  ;;  %v385_v24 = vsel %vm353_vm5, %v321_v6, %v369_v10 }
 0x108   :  { %v378_v25 = vsel %vm346_vm6, %v292_v11, %v362_v17  ;;  %v619_v27 = vpop.f32.mrb[11].mxu0  ;;  %v643_v28 = vpop.f32.mrb[11].mxu1 }
 0x109   :  { %v386_v26 = vsel %vm354_vm7, %v324_v12, %v370_v18  ;;  %v548_v29 = vpack.c.bf16 %v378_v25, %v377_v23  ;;  %v297_v31 = vadd.f32 %v617_v19, %v826_v34  ;;  %v329_v32 = vadd.f32 %v641_v20, %v826_v34 }
 0x10a   :  { %v568_v30 = vpack.c.bf16 %v386_v26, %v385_v24  ;;  %v620_v33 = vadd.f32 %v619_v27, %v618_v21  ;;  %v644_v35 = vadd.f32 %v643_v28, %v642_v22 }
 0x10b   :  { %580 = vst [vmem:[%s871_s3 + $0x8] sm:$0xff] %v548_v29   ;;  %v363_v36 = vmul.f32 0.2, %v297_v31  ;;  %v371_v37 = vmul.f32 0.2, %v329_v32  ;;  %vm347_vm8 = vcmp.ge.f32.partialorder %v297_v31, 0.0 }
 0x10c   :  { %584 = vst [vmem:[%s871_s3 + $0x28] sm:$0xff] %v568_v30   ;;  %v300_v38 = vadd.f32 %v620_v33, %v826_v34  ;;  %v332_v39 = vadd.f32 %v644_v35, %v826_v34  ;;  %vm355_vm9 = vcmp.ge.f32.partialorder %v329_v32, 0.0 }
 0x10d   :  { %v621_v40 = vpop.f32.mrb[12].mxu0  ;;  %v645_v41 = vpop.f32.mrb[12].mxu1  ;;  %v379_v50 = vsel %vm347_vm8, %v297_v31, %v363_v36  ;;  %v387_v51 = vsel %vm355_vm9, %v329_v32, %v371_v37 }
 0x10e   :  { %v622_v42 = vpop.f32.mrb[13].mxu0  ;;  %v646_v43 = vpop.f32.mrb[13].mxu1  ;;  %vm348_vm10 = vcmp.ge.f32.partialorder %v300_v38, 0.0  ;;  %v364_v44 = vmul.f32 0.2, %v300_v38  ;;  %vm356_vm11 = vcmp.ge.f32.partialorder %v332_v39, 0.0 }
 0x10f   :  { %v372_v45 = vmul.f32 0.2, %v332_v39  ;;  %v623_v46 = vadd.f32 %v622_v42, %v621_v40  ;;  %v647_v47 = vadd.f32 %v646_v43, %v645_v41  ;;  %v624_v48 = vpop.f32.mrb[14].mxu0  ;;  %v648_v49 = vpop.f32.mrb[14].mxu1 }
 0x110   :  { %v380_v52 = vsel %vm348_vm10, %v300_v38, %v364_v44  ;;  %v625_v54 = vpop.f32.mrb[15].mxu0  ;;  %v649_v55 = vpop.f32.mrb[15].mxu1 }
 0x111   :  { %v388_v53 = vsel %vm356_vm11, %v332_v39, %v372_v45  ;;  %v553_v56 = vpack.c.bf16 %v380_v52, %v379_v50  ;;  %v305_v58 = vadd.f32 %v623_v46, %v826_v34  ;;  %v337_v59 = vadd.f32 %v647_v47, %v826_v34 }
 0x112   :  { %v573_v57 = vpack.c.bf16 %v388_v53, %v387_v51  ;;  %v626_v60 = vadd.f32 %v625_v54, %v624_v48  ;;  %v650_v61 = vadd.f32 %v649_v55, %v648_v49 }
 0x113   :  { %581 = vst [vmem:[%s871_s3 + $0x10] sm:$0xff] %v553_v56   ;;  %v365_v62 = vmul.f32 0.2, %v305_v58  ;;  %v373_v63 = vmul.f32 0.2, %v337_v59  ;;  %vm349_vm12 = vcmp.ge.f32.partialorder %v305_v58, 0.0 }
 0x114   :  { %585 = vst [vmem:[%s871_s3 + $0x30] sm:$0xff] %v573_v57   ;;  %v308_v0 = vadd.f32 %v626_v60, %v826_v34  ;;  %v340_v1 = vadd.f32 %v650_v61, %v826_v34  ;;  %vm357_vm13 = vcmp.ge.f32.partialorder %v337_v59, 0.0 }
 0x115   :  { %v381_v4 = vsel %vm349_vm12, %v305_v58, %v365_v62  ;;  %v389_v5 = vsel %vm357_vm13, %v337_v59, %v373_v63 }
 0x116   :  { %vm350_vm14 = vcmp.ge.f32.partialorder %v308_v0, 0.0  ;;  %v366_v2 = vmul.f32 0.2, %v308_v0  ;;  %vm358_vm15 = vcmp.ge.f32.partialorder %v340_v1, 0.0  ;;  %v374_v3 = vmul.f32 0.2, %v340_v1 }
 0x118   :  { %v382_v6 = vsel %vm350_vm14, %v308_v0, %v366_v2  ;;  %v390_v7 = vsel %vm358_vm15, %v340_v1, %v374_v3 }
 0x119   :  { %v558_v8 = vpack.c.bf16 %v382_v6, %v381_v4  ;;  %v578_v9 = vpack.c.bf16 %v390_v7, %v389_v5 }
 0x11b   :  { %582 = vst [vmem:[%s871_s3 + $0x18] sm:$0xff] %v558_v8   ;;  %586 = vst [vmem:[%s871_s3 + $0x38] sm:$0xff] %v578_v9  }

// kernel: fc_discriminator.8
= control target key start
LH: loop header
LB: loop body
LE: loop exit
PB: predicated region body
PF: predicated region fallthrough
CT: control target
= control target key end

     0   :  { %s1405_s1 = inlined_call_operand.vmem [shape: bf16[512,128], index: 1, kind: input, shape index: {}]   ;;  %s1406_s0 = inlined_call_operand.vmem [shape: bf16[128,512], index: 0, kind: input, shape index: {}]   ;;  %s1407_s2 = inlined_call_operand.vmem [shape: f32[1,128], index: 2, kind: input, shape index: {}]   ;;  %s1408_s3 = inlined_call_operand.vmem [shape: bf16[128,128], index: 3, kind: output, shape index: {}]  }
   0x1   :  { %v1068_v0 = vld [vmem:[%s1405_s1 + $0x40] sm:$0xff]   ;;  %v1072_v4 = vld [vmem:[%s1405_s1 + $0x48] sm:$0xff]   ;;  %v1076_v8 = vld [vmem:[%s1405_s1 + $0x50] sm:$0xff]  }
   0x2   :  { %v1069_v1 = vld [vmem:[%s1405_s1 + $0xc0] sm:$0xff]   ;;  %940 = vmatprep.subr.bf16.mxu0 %v1068_v0  ;;  %v1073_v5 = vld [vmem:[%s1405_s1 + $0xc8] sm:$0xff]   ;;  %v1077_v9 = vld [vmem:[%s1405_s1 + $0xd0] sm:$0xff]  }
   0x3   :  { %v1070_v2 = vld [vmem:[%s1405_s1] sm:$0xff]   ;;  %1004 = vmatprep.subr.bf16.mxu1 %v1069_v1  ;;  %v1074_v6 = vld [vmem:[%s1405_s1 + $0x8] sm:$0xff]   ;;  %v1078_v10 = vld [vmem:[%s1405_s1 + $0x10] sm:$0xff]  }
   0x4   :  { %v1071_v3 = vld [vmem:[%s1405_s1 + $0x80] sm:$0xff]   ;;  %941 = vmatpush3.bf16.msra.mxu0 %v1070_v2  ;;  %v1075_v7 = vld [vmem:[%s1405_s1 + $0x88] sm:$0xff]   ;;  %v1079_v11 = vld [vmem:[%s1405_s1 + $0x90] sm:$0xff]  }
   0x5   :  { %1005 = vmatpush3.bf16.msra.mxu1 %v1071_v3  ;;  %942 = vmatprep.subr.bf16.mxu0 %v1072_v4  ;;  %v1080_v12 = vld [vmem:[%s1405_s1 + $0x58] sm:$0xff]   ;;  %v1084_v16 = vld [vmem:[%s1405_s1 + $0x60] sm:$0xff]   ;;  %v1088_v20 = vld [vmem:[%s1405_s1 + $0x68] sm:$0xff]  }
   0x6   :  { %1006 = vmatprep.subr.bf16.mxu1 %v1073_v5  ;;  %v1081_v13 = vld [vmem:[%s1405_s1 + $0xd8] sm:$0xff]   ;;  %v1085_v17 = vld [vmem:[%s1405_s1 + $0xe0] sm:$0xff]   ;;  %v1089_v21 = vld [vmem:[%s1405_s1 + $0xe8] sm:$0xff]  }
   0x7   :  { %v1082_v14 = vld [vmem:[%s1405_s1 + $0x18] sm:$0xff]   ;;  %v1086_v18 = vld [vmem:[%s1405_s1 + $0x20] sm:$0xff]   ;;  %v1090_v22 = vld [vmem:[%s1405_s1 + $0x28] sm:$0xff]  }
   0x8   :  { %943 = vmatpush3.bf16.msra.mxu0 %v1074_v6  ;;  %v1083_v15 = vld [vmem:[%s1405_s1 + $0x98] sm:$0xff]   ;;  %v1087_v19 = vld [vmem:[%s1405_s1 + $0xa0] sm:$0xff]   ;;  %v1091_v23 = vld [vmem:[%s1405_s1 + $0xa8] sm:$0xff]  }
   0x9   :  { %1007 = vmatpush3.bf16.msra.mxu1 %v1075_v7  ;;  %944 = vmatprep.subr.bf16.mxu0 %v1076_v8  ;;  %v1092_v24 = vld [vmem:[%s1405_s1 + $0x70] sm:$0xff]   ;;  %v1096_v28 = vld [vmem:[%s1405_s1 + $0x78] sm:$0xff]   ;;  %v1363_v2 = vld [vmem:[%s1407_s2] ss:$0 sm:$0xff] }
   0xa   :  { %1008 = vmatprep.subr.bf16.mxu1 %v1077_v9  ;;  %v1093_v25 = vld [vmem:[%s1405_s1 + $0xf0] sm:$0xff]   ;;  %v1097_v29 = vld [vmem:[%s1405_s1 + $0xf8] sm:$0xff]  }
   0xb   :  { %v1094_v26 = vld [vmem:[%s1405_s1 + $0x30] sm:$0xff]   ;;  %v1098_v30 = vld [vmem:[%s1405_s1 + $0x38] sm:$0xff]  }
   0xc   :  { %945 = vmatpush3.bf16.msra.mxu0 %v1078_v10  ;;  %v1095_v27 = vld [vmem:[%s1405_s1 + $0xb0] sm:$0xff]   ;;  %v1099_v31 = vld [vmem:[%s1405_s1 + $0xb8] sm:$0xff]  }
   0xd   :  { %1009 = vmatpush3.bf16.msra.mxu1 %v1079_v11  ;;  %946 = vmatprep.subr.bf16.mxu0 %v1080_v12  ;;  %v1100_v32 = vld [vmem:[%s1406_s0] ss:$16 sps:$4 sm:$0xff]   ;;  %v1102_v33 = vld [vmem:[%s1406_s0 + $0x4] ss:$16 sps:$4 sm:$0xff]   ;;  %v1103_v34 = vld [vmem:[%s1406_s0 + $0x8] ss:$16 sps:$4 sm:$0xff]  }
   0xe   :  { %1010 = vmatprep.subr.bf16.mxu1 %v1081_v13  ;;  %v1105_v35 = vld [vmem:[%s1406_s0 + $0xc] ss:$16 sps:$4 sm:$0xff]   ;;  %502 = vmatprep.mubr.bf16.mxu0 %v1102_v33  ;;  %v1106_v36 = vld [vmem:[%s1406_s0 + $0x24] ss:$16 sps:$4 sm:$0xff]   ;;  %v1110_v38 = vld [vmem:[%s1406_s0 + $0x20] ss:$16 sps:$4 sm:$0xff]  }
   0xf   :  { %599 = vmatprep.mubr.bf16.mxu1 %v1105_v35  ;;  %v1108_v37 = vld [vmem:[%s1406_s0 + $0x2c] ss:$16 sps:$4 sm:$0xff]   ;;  %v1111_v39 = vld [vmem:[%s1406_s0 + $0x28] ss:$16 sps:$4 sm:$0xff]   ;;  %v1112_v40 = vld [vmem:[%s1406_s0 + $0x44] ss:$16 sps:$4 sm:$0xff]  }
  0x10   :  { %947 = vmatpush3.bf16.msra.mxu0 %v1082_v14  ;;  %v1114_v41 = vld [vmem:[%s1406_s0 + $0x4c] ss:$16 sps:$4 sm:$0xff]   ;;  %v1116_v42 = vld [vmem:[%s1406_s0 + $0x40] ss:$16 sps:$4 sm:$0xff]   ;;  %v1117_v43 = vld [vmem:[%s1406_s0 + $0x48] ss:$16 sps:$4 sm:$0xff]  }
  0x11   :  { %1011 = vmatpush3.bf16.msra.mxu1 %v1083_v15  ;;  %948 = vmatprep.subr.bf16.mxu0 %v1084_v16  ;;  %v1118_v44 = vld [vmem:[%s1406_s0 + $0x64] ss:$16 sps:$4 sm:$0xff]   ;;  %v1120_v45 = vld [vmem:[%s1406_s0 + $0x6c] ss:$16 sps:$4 sm:$0xff]   ;;  %v1122_v46 = vld [vmem:[%s1406_s0 + $0x60] ss:$16 sps:$4 sm:$0xff]  }
  0x12   :  { %1012 = vmatprep.subr.bf16.mxu1 %v1085_v17  ;;  %v1123_v47 = vld [vmem:[%s1406_s0 + $0x68] ss:$16 sps:$4 sm:$0xff]   ;;  %v1124_v48 = vld [vmem:[%s1406_s0 + $0x84] ss:$16 sps:$4 sm:$0xff]   ;;  %v1126_v49 = vld [vmem:[%s1406_s0 + $0x8c] ss:$16 sps:$4 sm:$0xff]  }
  0x13   :  { %v1128_v50 = vld [vmem:[%s1406_s0 + $0x80] ss:$16 sps:$4 sm:$0xff]   ;;  %v1129_v51 = vld [vmem:[%s1406_s0 + $0x88] ss:$16 sps:$4 sm:$0xff]   ;;  %v1130_v52 = vld [vmem:[%s1406_s0 + $0xa4] ss:$16 sps:$4 sm:$0xff]  }
  0x14   :  { %949 = vmatpush3.bf16.msra.mxu0 %v1086_v18  ;;  %v1132_v53 = vld [vmem:[%s1406_s0 + $0xac] ss:$16 sps:$4 sm:$0xff]   ;;  %v1134_v54 = vld [vmem:[%s1406_s0 + $0xa0] ss:$16 sps:$4 sm:$0xff]   ;;  %v1135_v55 = vld [vmem:[%s1406_s0 + $0xa8] ss:$16 sps:$4 sm:$0xff]  }
  0x15   :  { %1013 = vmatpush3.bf16.msra.mxu1 %v1087_v19  ;;  %950 = vmatprep.subr.bf16.mxu0 %v1088_v20  ;;  %v1136_v56 = vld [vmem:[%s1406_s0 + $0xc4] ss:$16 sps:$4 sm:$0xff]   ;;  %v1138_v57 = vld [vmem:[%s1406_s0 + $0xcc] ss:$16 sps:$4 sm:$0xff]   ;;  %v1140_v58 = vld [vmem:[%s1406_s0 + $0xc0] ss:$16 sps:$4 sm:$0xff]  }
  0x16   :  { %1014 = vmatprep.subr.bf16.mxu1 %v1089_v21  ;;  %v1141_v59 = vld [vmem:[%s1406_s0 + $0xc8] ss:$16 sps:$4 sm:$0xff]   ;;  %v1142_v60 = vld [vmem:[%s1406_s0 + $0xe4] ss:$16 sps:$4 sm:$0xff]   ;;  %v1144_v61 = vld [vmem:[%s1406_s0 + $0xec] ss:$16 sps:$4 sm:$0xff]  }
  0x17   :  { %v1146_v62 = vld [vmem:[%s1406_s0 + $0xe0] ss:$16 sps:$4 sm:$0xff]   ;;  %v1147_v63 = vld [vmem:[%s1406_s0 + $0xe8] ss:$16 sps:$4 sm:$0xff]  }
  0x18   :  { %951 = vmatpush3.bf16.msra.mxu0 %v1090_v22 }
  0x19   :  { %1015 = vmatpush3.bf16.msra.mxu1 %v1091_v23  ;;  %952 = vmatprep.subr.bf16.mxu0 %v1092_v24 }
  0x1a   :  { %1016 = vmatprep.subr.bf16.mxu1 %v1093_v25 }
  0x1c   :  { %953 = vmatpush3.bf16.msra.mxu0 %v1094_v26 }
  0x1d   :  { %1017 = vmatpush3.bf16.msra.mxu1 %v1095_v27  ;;  %954 = vmatprep.subr.bf16.mxu0 %v1096_v28 }
  0x1e   :  { %1018 = vmatprep.subr.bf16.mxu1 %v1097_v29 }
  0x20   :  { %955 = vmatpush3.bf16.msra.mxu0 %v1098_v30 }
  0x21   :  { %1019 = vmatpush3.bf16.msra.mxu1 %v1099_v31 }
  0x23   :  { %503 = vmatmul.mubr.bf16.vlgmr.msra.gmra.mrb[0].mxu0 %v1100_v32 }
  0x24   :  { %600 = vmatmul.mubr.bf16.vlgmr.msra.gmra.mrb[0].mxu1 %v1103_v34  ;;  %510 = vmatprep.mubr.bf16.mxu0 %v1106_v36 }
  0x25   :  { %607 = vmatprep.mubr.bf16.mxu1 %v1108_v37 }
  0x2b   :  { %511 = vmatmul.mubr.bf16.gmra.mrb[4].mxu0 %v1110_v38 }
  0x2c   :  { %608 = vmatmul.mubr.bf16.gmra.mrb[4].mxu1 %v1111_v39  ;;  %518 = vmatprep.mubr.bf16.mxu0 %v1112_v40 }
  0x2d   :  { %615 = vmatprep.mubr.bf16.mxu1 %v1114_v41 }
  0x33   :  { %519 = vmatmul.mubr.bf16.gmra.mrb[8].mxu0 %v1116_v42 }
  0x34   :  { %616 = vmatmul.mubr.bf16.gmra.mrb[8].mxu1 %v1117_v43  ;;  %526 = vmatprep.mubr.bf16.mxu0 %v1118_v44 }
  0x35   :  { %623 = vmatprep.mubr.bf16.mxu1 %v1120_v45 }
  0x3b   :  { %527 = vmatmul.mubr.bf16.gmra.mrb[12].mxu0 %v1122_v46 }
  0x3c   :  { %624 = vmatmul.mubr.bf16.gmra.mrb[12].mxu1 %v1123_v47  ;;  %534 = vmatprep.mubr.bf16.mxu0 %v1124_v48 }
  0x3d   :  { %631 = vmatprep.mubr.bf16.mxu1 %v1126_v49 }
  0x43   :  { %535 = vmatmul.mubr.bf16.gmra.mrb[16].mxu0 %v1128_v50 }
  0x44   :  { %632 = vmatmul.mubr.bf16.gmra.mrb[16].mxu1 %v1129_v51  ;;  %542 = vmatprep.mubr.bf16.mxu0 %v1130_v52 }
  0x45   :  { %639 = vmatprep.mubr.bf16.mxu1 %v1132_v53 }
  0x4b   :  { %543 = vmatmul.mubr.bf16.gmra.mrb[20].mxu0 %v1134_v54 }
  0x4c   :  { %640 = vmatmul.mubr.bf16.gmra.mrb[20].mxu1 %v1135_v55  ;;  %550 = vmatprep.mubr.bf16.mxu0 %v1136_v56 }
  0x4d   :  { %647 = vmatprep.mubr.bf16.mxu1 %v1138_v57 }
  0x53   :  { %551 = vmatmul.mubr.bf16.gmra.mrb[24].mxu0 %v1140_v58 }
  0x54   :  { %648 = vmatmul.mubr.bf16.gmra.mrb[24].mxu1 %v1141_v59  ;;  %558 = vmatprep.mubr.bf16.mxu0 %v1142_v60 }
  0x55   :  { %655 = vmatprep.mubr.bf16.mxu1 %v1144_v61 }
  0x5b   :  { %559 = vmatmul.mubr.bf16.gmra.mrb[28].mxu0 %v1146_v62 }
  0x5c   :  { %656 = vmatmul.mubr.bf16.gmra.mrb[28].mxu1 %v1147_v63 }
  0xf6   :  { %v956_v0 = vpop.f32.mrb[0].mxu0 }
  0xf7   :  { %v1020_v1 = vpop.f32.mrb[0].mxu1  ;;  %v957_v3 = vpop.f32.mrb[1].mxu0 }
  0xf8   :  { %v958_v4 = vadd.f32 %v957_v3, %v956_v0  ;;  %v1021_v5 = vpop.f32.mrb[1].mxu1  ;;  %v959_v6 = vpop.f32.mrb[2].mxu0 }
  0xf9   :  { %v1022_v7 = vadd.f32 %v1021_v5, %v1020_v1  ;;  %v1023_v8 = vpop.f32.mrb[2].mxu1  ;;  %v960_v9 = vpop.f32.mrb[3].mxu0 }
  0xfa   :  { %v505_v10 = vadd.f32 %v958_v4, %v1363_v2  ;;  %v961_v11 = vadd.f32 %v960_v9, %v959_v6  ;;  %v1024_v12 = vpop.f32.mrb[3].mxu1 }
  0xfb   :  { %v1025_v13 = vadd.f32 %v1024_v12, %v1023_v8 }
  0xfc   :  { %v602_v14 = vadd.f32 %v1022_v7, %v505_v10  ;;  %v508_v15 = vadd.f32 %v961_v11, %v1363_v2 }
  0xfe   :  { %v680_v16 = vmul.f32 0.2, %v602_v14  ;;  %v605_v17 = vadd.f32 %v1025_v13, %v508_v15  ;;  %v962_v18 = vpop.f32.mrb[4].mxu0  ;;  %vm664_vm0 = vcmp.ge.f32.partialorder %v602_v14, 0.0 }
  0xff   :  { %v1026_v19 = vpop.f32.mrb[4].mxu1  ;;  %v963_v20 = vpop.f32.mrb[5].mxu0 }
 0x100   :  { %vm665_vm1 = vcmp.ge.f32.partialorder %v605_v17, 0.0  ;;  %v681_v21 = vmul.f32 0.2, %v605_v17  ;;  %v964_v22 = vadd.f32 %v963_v20, %v962_v18  ;;  %v1027_v23 = vpop.f32.mrb[5].mxu1  ;;  %v965_v24 = vpop.f32.mrb[6].mxu0  ;;  %v696_v28 = vsel %vm664_vm0, %v602_v14, %v680_v16 }
 0x101   :  { %v1028_v25 = vadd.f32 %v1027_v23, %v1026_v19  ;;  %v1029_v26 = vpop.f32.mrb[6].mxu1  ;;  %v966_v27 = vpop.f32.mrb[7].mxu0 }
 0x102   :  { %v697_v29 = vsel %vm665_vm1, %v605_v17, %v681_v21  ;;  %v513_v30 = vadd.f32 %v964_v22, %v1363_v2  ;;  %v967_v31 = vadd.f32 %v966_v27, %v965_v24  ;;  %v1030_v32 = vpop.f32.mrb[7].mxu1 }
 0x103   :  { %v896_v33 = vpack.c.bf16 %v697_v29, %v696_v28  ;;  %v1031_v34 = vadd.f32 %v1030_v32, %v1029_v26 }
 0x104   :  { %v610_v35 = vadd.f32 %v1028_v25, %v513_v30  ;;  %v516_v36 = vadd.f32 %v967_v31, %v1363_v2 }
 0x105   :  { %897 = vst [vmem:[%s1408_s3] sm:$0xff] %v896_v33  }
 0x106   :  { %v682_v37 = vmul.f32 0.2, %v610_v35  ;;  %v613_v38 = vadd.f32 %v1031_v34, %v516_v36  ;;  %v968_v39 = vpop.f32.mrb[8].mxu0  ;;  %vm666_vm2 = vcmp.ge.f32.partialorder %v610_v35, 0.0 }
 0x107   :  { %v1032_v40 = vpop.f32.mrb[8].mxu1  ;;  %v969_v41 = vpop.f32.mrb[9].mxu0 }
 0x108   :  { %vm667_vm3 = vcmp.ge.f32.partialorder %v613_v38, 0.0  ;;  %v683_v42 = vmul.f32 0.2, %v613_v38  ;;  %v970_v43 = vadd.f32 %v969_v41, %v968_v39  ;;  %v1033_v44 = vpop.f32.mrb[9].mxu1  ;;  %v971_v45 = vpop.f32.mrb[10].mxu0  ;;  %v698_v49 = vsel %vm666_vm2, %v610_v35, %v682_v37 }
 0x109   :  { %v1034_v46 = vadd.f32 %v1033_v44, %v1032_v40  ;;  %v1035_v47 = vpop.f32.mrb[10].mxu1  ;;  %v972_v48 = vpop.f32.mrb[11].mxu0 }
 0x10a   :  { %v699_v50 = vsel %vm667_vm3, %v613_v38, %v683_v42  ;;  %v521_v51 = vadd.f32 %v970_v43, %v1363_v2  ;;  %v973_v52 = vadd.f32 %v972_v48, %v971_v45  ;;  %v1036_v53 = vpop.f32.mrb[11].mxu1 }
 0x10b   :  { %v901_v54 = vpack.c.bf16 %v699_v50, %v698_v49  ;;  %v1037_v55 = vadd.f32 %v1036_v53, %v1035_v47 }
 0x10c   :  { %v618_v56 = vadd.f32 %v1034_v46, %v521_v51  ;;  %v524_v57 = vadd.f32 %v973_v52, %v1363_v2 }
 0x10d   :  { %933 = vst [vmem:[%s1408_s3 + $0x8] sm:$0xff] %v901_v54  }
 0x10e   :  { %v684_v58 = vmul.f32 0.2, %v618_v56  ;;  %v621_v59 = vadd.f32 %v1037_v55, %v524_v57  ;;  %v974_v60 = vpop.f32.mrb[12].mxu0  ;;  %vm668_vm4 = vcmp.ge.f32.partialorder %v618_v56, 0.0 }
 0x10f   :  { %v1038_v61 = vpop.f32.mrb[12].mxu1  ;;  %v975_v62 = vpop.f32.mrb[13].mxu0 }
 0x110   :  { %vm669_vm5 = vcmp.ge.f32.partialorder %v621_v59, 0.0  ;;  %v685_v63 = vmul.f32 0.2, %v621_v59  ;;  %v976_v0 = vadd.f32 %v975_v62, %v974_v60  ;;  %v1039_v1 = vpop.f32.mrb[13].mxu1  ;;  %v977_v3 = vpop.f32.mrb[14].mxu0  ;;  %v700_v7 = vsel %vm668_vm4, %v618_v56, %v684_v58 }
 0x111   :  { %v1040_v4 = vadd.f32 %v1039_v1, %v1038_v61  ;;  %v1041_v5 = vpop.f32.mrb[14].mxu1  ;;  %v978_v6 = vpop.f32.mrb[15].mxu0 }
 0x112   :  { %v701_v8 = vsel %vm669_vm5, %v621_v59, %v685_v63  ;;  %v529_v9 = vadd.f32 %v976_v0, %v1363_v2  ;;  %v979_v10 = vadd.f32 %v978_v6, %v977_v3  ;;  %v1042_v11 = vpop.f32.mrb[15].mxu1 }
 0x113   :  { %v906_v12 = vpack.c.bf16 %v701_v8, %v700_v7  ;;  %v1043_v13 = vadd.f32 %v1042_v11, %v1041_v5 }
 0x114   :  { %v626_v14 = vadd.f32 %v1040_v4, %v529_v9  ;;  %v532_v15 = vadd.f32 %v979_v10, %v1363_v2 }
 0x115   :  { %934 = vst [vmem:[%s1408_s3 + $0x10] sm:$0xff] %v906_v12  }
 0x116   :  { %v686_v16 = vmul.f32 0.2, %v626_v14  ;;  %v629_v17 = vadd.f32 %v1043_v13, %v532_v15  ;;  %v980_v18 = vpop.f32.mrb[16].mxu0  ;;  %vm670_vm6 = vcmp.ge.f32.partialorder %v626_v14, 0.0 }
 0x117   :  { %v1044_v19 = vpop.f32.mrb[16].mxu1  ;;  %v981_v20 = vpop.f32.mrb[17].mxu0 }
 0x118   :  { %vm671_vm7 = vcmp.ge.f32.partialorder %v629_v17, 0.0  ;;  %v687_v21 = vmul.f32 0.2, %v629_v17  ;;  %v982_v22 = vadd.f32 %v981_v20, %v980_v18  ;;  %v1045_v23 = vpop.f32.mrb[17].mxu1  ;;  %v983_v24 = vpop.f32.mrb[18].mxu0  ;;  %v702_v28 = vsel %vm670_vm6, %v626_v14, %v686_v16 }
 0x119   :  { %v1046_v25 = vadd.f32 %v1045_v23, %v1044_v19  ;;  %v1047_v26 = vpop.f32.mrb[18].mxu1  ;;  %v984_v27 = vpop.f32.mrb[19].mxu0 }
 0x11a   :  { %v703_v29 = vsel %vm671_vm7, %v629_v17, %v687_v21  ;;  %v537_v30 = vadd.f32 %v982_v22, %v1363_v2  ;;  %v985_v31 = vadd.f32 %v984_v27, %v983_v24  ;;  %v1048_v32 = vpop.f32.mrb[19].mxu1 }
 0x11b   :  { %v911_v33 = vpack.c.bf16 %v703_v29, %v702_v28  ;;  %v1049_v34 = vadd.f32 %v1048_v32, %v1047_v26 }
 0x11c   :  { %v634_v35 = vadd.f32 %v1046_v25, %v537_v30  ;;  %v540_v36 = vadd.f32 %v985_v31, %v1363_v2 }
 0x11d   :  { %935 = vst [vmem:[%s1408_s3 + $0x18] sm:$0xff] %v911_v33  }
 0x11e   :  { %v688_v37 = vmul.f32 0.2, %v634_v35  ;;  %v637_v38 = vadd.f32 %v1049_v34, %v540_v36  ;;  %v986_v39 = vpop.f32.mrb[20].mxu0  ;;  %vm672_vm8 = vcmp.ge.f32.partialorder %v634_v35, 0.0 }
 0x11f   :  { %v1050_v40 = vpop.f32.mrb[20].mxu1  ;;  %v987_v41 = vpop.f32.mrb[21].mxu0 }
 0x120   :  { %vm673_vm9 = vcmp.ge.f32.partialorder %v637_v38, 0.0  ;;  %v689_v42 = vmul.f32 0.2, %v637_v38  ;;  %v988_v43 = vadd.f32 %v987_v41, %v986_v39  ;;  %v1051_v44 = vpop.f32.mrb[21].mxu1  ;;  %v989_v45 = vpop.f32.mrb[22].mxu0  ;;  %v704_v49 = vsel %vm672_vm8, %v634_v35, %v688_v37 }
 0x121   :  { %v1052_v46 = vadd.f32 %v1051_v44, %v1050_v40  ;;  %v1053_v47 = vpop.f32.mrb[22].mxu1  ;;  %v990_v48 = vpop.f32.mrb[23].mxu0 }
 0x122   :  { %v705_v50 = vsel %vm673_vm9, %v637_v38, %v689_v42  ;;  %v545_v51 = vadd.f32 %v988_v43, %v1363_v2  ;;  %v991_v52 = vadd.f32 %v990_v48, %v989_v45  ;;  %v1054_v53 = vpop.f32.mrb[23].mxu1 }
 0x123   :  { %v916_v54 = vpack.c.bf16 %v705_v50, %v704_v49  ;;  %v1055_v55 = vadd.f32 %v1054_v53, %v1053_v47 }
 0x124   :  { %v642_v56 = vadd.f32 %v1052_v46, %v545_v51  ;;  %v548_v57 = vadd.f32 %v991_v52, %v1363_v2 }
 0x125   :  { %936 = vst [vmem:[%s1408_s3 + $0x20] sm:$0xff] %v916_v54  }
 0x126   :  { %v690_v58 = vmul.f32 0.2, %v642_v56  ;;  %v645_v59 = vadd.f32 %v1055_v55, %v548_v57  ;;  %v992_v60 = vpop.f32.mrb[24].mxu0  ;;  %vm674_vm10 = vcmp.ge.f32.partialorder %v642_v56, 0.0 }
 0x127   :  { %v1056_v61 = vpop.f32.mrb[24].mxu1  ;;  %v993_v62 = vpop.f32.mrb[25].mxu0 }
 0x128   :  { %vm675_vm11 = vcmp.ge.f32.partialorder %v645_v59, 0.0  ;;  %v691_v63 = vmul.f32 0.2, %v645_v59  ;;  %v994_v0 = vadd.f32 %v993_v62, %v992_v60  ;;  %v1057_v1 = vpop.f32.mrb[25].mxu1  ;;  %v995_v3 = vpop.f32.mrb[26].mxu0  ;;  %v706_v7 = vsel %vm674_vm10, %v642_v56, %v690_v58 }
 0x129   :  { %v1058_v4 = vadd.f32 %v1057_v1, %v1056_v61  ;;  %v1059_v5 = vpop.f32.mrb[26].mxu1  ;;  %v996_v6 = vpop.f32.mrb[27].mxu0 }
 0x12a   :  { %v707_v8 = vsel %vm675_vm11, %v645_v59, %v691_v63  ;;  %v553_v9 = vadd.f32 %v994_v0, %v1363_v2  ;;  %v997_v10 = vadd.f32 %v996_v6, %v995_v3  ;;  %v1060_v11 = vpop.f32.mrb[27].mxu1 }
 0x12b   :  { %v921_v12 = vpack.c.bf16 %v707_v8, %v706_v7  ;;  %v1061_v13 = vadd.f32 %v1060_v11, %v1059_v5 }
 0x12c   :  { %v650_v14 = vadd.f32 %v1058_v4, %v553_v9  ;;  %v556_v15 = vadd.f32 %v997_v10, %v1363_v2 }
 0x12d   :  { %937 = vst [vmem:[%s1408_s3 + $0x28] sm:$0xff] %v921_v12  }
 0x12e   :  { %v692_v16 = vmul.f32 0.2, %v650_v14  ;;  %v653_v17 = vadd.f32 %v1061_v13, %v556_v15  ;;  %v998_v18 = vpop.f32.mrb[28].mxu0  ;;  %vm676_vm12 = vcmp.ge.f32.partialorder %v650_v14, 0.0 }
 0x12f   :  { %v1062_v19 = vpop.f32.mrb[28].mxu1  ;;  %v999_v20 = vpop.f32.mrb[29].mxu0 }
 0x130   :  { %vm677_vm13 = vcmp.ge.f32.partialorder %v653_v17, 0.0  ;;  %v693_v21 = vmul.f32 0.2, %v653_v17  ;;  %v1000_v22 = vadd.f32 %v999_v20, %v998_v18  ;;  %v1063_v23 = vpop.f32.mrb[29].mxu1  ;;  %v1001_v24 = vpop.f32.mrb[30].mxu0  ;;  %v708_v28 = vsel %vm676_vm12, %v650_v14, %v692_v16 }
 0x131   :  { %v1064_v25 = vadd.f32 %v1063_v23, %v1062_v19  ;;  %v1065_v26 = vpop.f32.mrb[30].mxu1  ;;  %v1002_v27 = vpop.f32.mrb[31].mxu0 }
 0x132   :  { %v709_v29 = vsel %vm677_vm13, %v653_v17, %v693_v21  ;;  %v561_v30 = vadd.f32 %v1000_v22, %v1363_v2  ;;  %v1003_v31 = vadd.f32 %v1002_v27, %v1001_v24  ;;  %v1066_v32 = vpop.f32.mrb[31].mxu1 }
 0x133   :  { %v926_v33 = vpack.c.bf16 %v709_v29, %v708_v28  ;;  %v1067_v34 = vadd.f32 %v1066_v32, %v1065_v26 }
 0x134   :  { %v658_v35 = vadd.f32 %v1064_v25, %v561_v30  ;;  %v564_v36 = vadd.f32 %v1003_v31, %v1363_v2 }
 0x135   :  { %938 = vst [vmem:[%s1408_s3 + $0x30] sm:$0xff] %v926_v33  }
 0x136   :  { %v694_v37 = vmul.f32 0.2, %v658_v35  ;;  %v661_v38 = vadd.f32 %v1067_v34, %v564_v36  ;;  %vm678_vm14 = vcmp.ge.f32.partialorder %v658_v35, 0.0 }
 0x138   :  { %vm679_vm15 = vcmp.ge.f32.partialorder %v661_v38, 0.0  ;;  %v695_v39 = vmul.f32 0.2, %v661_v38  ;;  %v710_v40 = vsel %vm678_vm14, %v658_v35, %v694_v37 }
 0x13a   :  { %v711_v41 = vsel %vm679_vm15, %v661_v38, %v695_v39 }
 0x13b   :  { %v931_v42 = vpack.c.bf16 %v711_v41, %v710_v40 }
 0x13d   :  { %939 = vst [vmem:[%s1408_s3 + $0x38] sm:$0xff] %v931_v42  }

// kernel: fc_discriminator.9
= control target key start
LH: loop header
LB: loop body
LE: loop exit
PB: predicated region body
PF: predicated region fallthrough
CT: control target
= control target key end

     0   :  { %s2296_s1 = inlined_call_operand.vmem [shape: bf16[1024,128], index: 1, kind: input, shape index: {}]   ;;  %s2297_s0 = inlined_call_operand.vmem [shape: bf16[128,1024], index: 0, kind: input, shape index: {}]   ;;  %s2298_s2 = inlined_call_operand.vmem [shape: f32[1,128], index: 2, kind: input, shape index: {}]   ;;  %s2299_s3 = inlined_call_operand.vmem [shape: f32[128,128], index: 3, kind: output, shape index: {}]  }
   0x1   :  { %v1711_v0 = vld [vmem:[%s2296_s1 + $0x40] sm:$0xff]   ;;  %v1715_v4 = vld [vmem:[%s2296_s1 + $0x48] sm:$0xff]   ;;  %v1719_v8 = vld [vmem:[%s2296_s1 + $0x50] sm:$0xff]  }
   0x2   :  { %v1712_v1 = vld [vmem:[%s2296_s1 + $0xc0] sm:$0xff]   ;;  %1455 = vmatprep.subr.bf16.mxu0 %v1711_v0  ;;  %v1716_v5 = vld [vmem:[%s2296_s1 + $0xc8] sm:$0xff]   ;;  %v1720_v9 = vld [vmem:[%s2296_s1 + $0xd0] sm:$0xff]  }
   0x3   :  { %v1713_v2 = vld [vmem:[%s2296_s1] sm:$0xff]   ;;  %1519 = vmatprep.subr.bf16.mxu1 %v1712_v1  ;;  %v1717_v6 = vld [vmem:[%s2296_s1 + $0x8] sm:$0xff]   ;;  %v1721_v10 = vld [vmem:[%s2296_s1 + $0x10] sm:$0xff]  }
   0x4   :  { %v1714_v3 = vld [vmem:[%s2296_s1 + $0x80] sm:$0xff]   ;;  %1456 = vmatpush3.bf16.msra.mxu0 %v1713_v2  ;;  %v1718_v7 = vld [vmem:[%s2296_s1 + $0x88] sm:$0xff]   ;;  %v1722_v11 = vld [vmem:[%s2296_s1 + $0x90] sm:$0xff]  }
   0x5   :  { %1520 = vmatpush3.bf16.msra.mxu1 %v1714_v3  ;;  %1457 = vmatprep.subr.bf16.mxu0 %v1715_v4  ;;  %v1723_v12 = vld [vmem:[%s2296_s1 + $0x58] sm:$0xff]   ;;  %v1727_v16 = vld [vmem:[%s2296_s1 + $0x60] sm:$0xff]   ;;  %v1731_v20 = vld [vmem:[%s2296_s1 + $0x68] sm:$0xff]  }
   0x6   :  { %1521 = vmatprep.subr.bf16.mxu1 %v1716_v5  ;;  %v1724_v13 = vld [vmem:[%s2296_s1 + $0xd8] sm:$0xff]   ;;  %v1728_v17 = vld [vmem:[%s2296_s1 + $0xe0] sm:$0xff]   ;;  %v1732_v21 = vld [vmem:[%s2296_s1 + $0xe8] sm:$0xff]  }
   0x7   :  { %v1725_v14 = vld [vmem:[%s2296_s1 + $0x18] sm:$0xff]   ;;  %v1729_v18 = vld [vmem:[%s2296_s1 + $0x20] sm:$0xff]   ;;  %v1733_v22 = vld [vmem:[%s2296_s1 + $0x28] sm:$0xff]  }
   0x8   :  { %1458 = vmatpush3.bf16.msra.mxu0 %v1717_v6  ;;  %v1726_v15 = vld [vmem:[%s2296_s1 + $0x98] sm:$0xff]   ;;  %v1730_v19 = vld [vmem:[%s2296_s1 + $0xa0] sm:$0xff]   ;;  %v1734_v23 = vld [vmem:[%s2296_s1 + $0xa8] sm:$0xff]  }
   0x9   :  { %1522 = vmatpush3.bf16.msra.mxu1 %v1718_v7  ;;  %1459 = vmatprep.subr.bf16.mxu0 %v1719_v8  ;;  %v1735_v24 = vld [vmem:[%s2296_s1 + $0x70] sm:$0xff]   ;;  %v1739_v28 = vld [vmem:[%s2296_s1 + $0x78] sm:$0xff]   ;;  %v15_v32 = vld [vmem:[%s2297_s0] sm:$0xff] }
   0xa   :  { %1523 = vmatprep.subr.bf16.mxu1 %v1720_v9  ;;  %v1736_v25 = vld [vmem:[%s2296_s1 + $0xf0] sm:$0xff]   ;;  %v1740_v29 = vld [vmem:[%s2296_s1 + $0xf8] sm:$0xff]   ;;  %v19_v33 = vld [vmem:[%s2297_s0 + $0x20] sm:$0xff] }
   0xb   :  { %v1737_v26 = vld [vmem:[%s2296_s1 + $0x30] sm:$0xff]   ;;  %v1741_v30 = vld [vmem:[%s2296_s1 + $0x38] sm:$0xff]   ;;  %v16_v34 = vld [vmem:[%s2297_s0 + $0x8] sm:$0xff]  ;;  %v1327_v35 = vcombine.low %v15_v32, %v19_v33  ;;  %v1328_v36 = vcombine.high %v15_v32, %v19_v33 }
   0xc   :  { %1460 = vmatpush3.bf16.msra.mxu0 %v1721_v10  ;;  %v1738_v27 = vld [vmem:[%s2296_s1 + $0xb0] sm:$0xff]   ;;  %v1742_v31 = vld [vmem:[%s2296_s1 + $0xb8] sm:$0xff]   ;;  %v20_v37 = vld [vmem:[%s2297_s0 + $0x28] sm:$0xff] }
   0xd   :  { %1524 = vmatpush3.bf16.msra.mxu1 %v1722_v11  ;;  %1461 = vmatprep.subr.bf16.mxu0 %v1723_v12  ;;  %v1329_v38 = vcombine.low %v16_v34, %v20_v37  ;;  %v1330_v39 = vcombine.high %v16_v34, %v20_v37  ;;  %v1743_v40 = vld [vmem:[%s2296_s1 + $0x140] sm:$0xff]   ;;  %v24_v47 = vld [vmem:[%s2297_s0 + $0x48] sm:$0xff]  ;;  %v1751_v62 = vld [vmem:[%s2296_s1 + $0x150] sm:$0xff]  }
   0xe   :  { %1525 = vmatprep.subr.bf16.mxu1 %v1724_v13  ;;  %950 = vmatprep.mubr.bf16.mxu0 %v1328_v36  ;;  %v1744_v41 = vld [vmem:[%s2296_s1 + $0x100] sm:$0xff]   ;;  %v28_v48 = vld [vmem:[%s2297_s0 + $0x68] sm:$0xff]  ;;  %v1752_v63 = vld [vmem:[%s2296_s1 + $0x110] sm:$0xff]  }
   0xf   :  { %1047 = vmatprep.mubr.bf16.mxu1 %v1330_v39  ;;  %v1745_v42 = vld [vmem:[%s2296_s1 + $0x1c0] sm:$0xff]   ;;  %v1338_v49 = vcombine.high %v24_v47, %v28_v48  ;;  %v1747_v50 = vld [vmem:[%s2296_s1 + $0x148] sm:$0xff]   ;;  %v1337_v53 = vcombine.low %v24_v47, %v28_v48  ;;  %v1753_v0 = vld [vmem:[%s2296_s1 + $0x1d0] sm:$0xff]  }
  0x10   :  { %1462 = vmatpush3.bf16.msra.mxu0 %v1725_v14  ;;  %v1746_v43 = vld [vmem:[%s2296_s1 + $0x180] sm:$0xff]   ;;  %v1748_v52 = vld [vmem:[%s2296_s1 + $0x108] sm:$0xff]   ;;  %v1754_v1 = vld [vmem:[%s2296_s1 + $0x190] sm:$0xff]  }
  0x11   :  { %1526 = vmatpush3.bf16.msra.mxu1 %v1726_v15  ;;  %1463 = vmatprep.subr.bf16.mxu0 %v1727_v16  ;;  %v23_v44 = vld [vmem:[%s2297_s0 + $0x40] sm:$0xff]  ;;  %v1749_v54 = vld [vmem:[%s2296_s1 + $0x1c8] sm:$0xff]   ;;  %v1755_v10 = vld [vmem:[%s2296_s1 + $0x158] sm:$0xff]  }
  0x12   :  { %1527 = vmatprep.subr.bf16.mxu1 %v1728_v17  ;;  %v27_v45 = vld [vmem:[%s2297_s0 + $0x60] sm:$0xff]  ;;  %v1750_v55 = vld [vmem:[%s2296_s1 + $0x188] sm:$0xff]   ;;  %v1756_v11 = vld [vmem:[%s2296_s1 + $0x118] sm:$0xff]  }
  0x13   :  { %v1336_v46 = vcombine.high %v23_v44, %v27_v45  ;;  %v1335_v51 = vcombine.low %v23_v44, %v27_v45  ;;  %v31_v56 = vld [vmem:[%s2297_s0 + $0x80] sm:$0xff]  ;;  %v32_v58 = vld [vmem:[%s2297_s0 + $0x88] sm:$0xff]  ;;  %v1757_v12 = vld [vmem:[%s2296_s1 + $0x1d8] sm:$0xff]  }
  0x14   :  { %1464 = vmatpush3.bf16.msra.mxu0 %v1729_v18  ;;  %v35_v57 = vld [vmem:[%s2297_s0 + $0xa0] sm:$0xff]  ;;  %v36_v59 = vld [vmem:[%s2297_s0 + $0xa8] sm:$0xff]  ;;  %v1758_v13 = vld [vmem:[%s2296_s1 + $0x198] sm:$0xff]  }
  0x15   :  { %1528 = vmatpush3.bf16.msra.mxu1 %v1730_v19  ;;  %1465 = vmatprep.subr.bf16.mxu0 %v1731_v20  ;;  %v1344_v60 = vcombine.high %v31_v56, %v35_v57  ;;  %v1346_v61 = vcombine.high %v32_v58, %v36_v59  ;;  %v1343_v2 = vcombine.low %v31_v56, %v35_v57  ;;  %v39_v3 = vld [vmem:[%s2297_s0 + $0xc0] sm:$0xff]  ;;  %v40_v5 = vld [vmem:[%s2297_s0 + $0xc8] sm:$0xff]  ;;  %v1768_v39 = vld [vmem:[%s2296_s1 + $0x130] sm:$0xff]  }
  0x16   :  { %1529 = vmatprep.subr.bf16.mxu1 %v1732_v21  ;;  %v43_v4 = vld [vmem:[%s2297_s0 + $0xe0] sm:$0xff]  ;;  %v1345_v6 = vcombine.low %v32_v58, %v36_v59  ;;  %v44_v8 = vld [vmem:[%s2297_s0 + $0xe8] sm:$0xff]  ;;  %v1772_v48 = vld [vmem:[%s2296_s1 + $0x138] sm:$0xff]  }
  0x17   :  { %v1352_v7 = vcombine.high %v39_v3, %v43_v4  ;;  %v1354_v9 = vcombine.high %v40_v5, %v44_v8  ;;  %v47_v14 = vld [vmem:[%s2297_s0 + $0x100] sm:$0xff]  ;;  %v48_v16 = vld [vmem:[%s2297_s0 + $0x108] sm:$0xff]  ;;  %v1351_v19 = vcombine.low %v39_v3, %v43_v4  ;;  %v1353_v21 = vcombine.low %v40_v5, %v44_v8  ;;  %v26_v8 = vld [vmem:[%s2297_s0 + $0x58] sm:$0xff] }
  0x18   :  { %1466 = vmatpush3.bf16.msra.mxu0 %v1733_v22  ;;  %v51_v15 = vld [vmem:[%s2297_s0 + $0x120] sm:$0xff]  ;;  %v52_v17 = vld [vmem:[%s2297_s0 + $0x128] sm:$0xff] }
  0x19   :  { %1530 = vmatpush3.bf16.msra.mxu1 %v1734_v23  ;;  %1467 = vmatprep.subr.bf16.mxu0 %v1735_v24  ;;  %v1759_v18 = vld [vmem:[%s2296_s1 + $0x160] sm:$0xff]   ;;  %v1360_v22 = vcombine.high %v47_v14, %v51_v15  ;;  %v1362_v24 = vcombine.high %v48_v16, %v52_v17  ;;  %v1765_v32 = vld [vmem:[%s2296_s1 + $0x1e8] sm:$0xff]   ;;  %v1359_v34 = vcombine.low %v47_v14, %v51_v15  ;;  %v33_v14 = vld [vmem:[%s2297_s0 + $0x90] sm:$0xff] }
  0x1a   :  { %1531 = vmatprep.subr.bf16.mxu1 %v1736_v25  ;;  %v1760_v20 = vld [vmem:[%s2296_s1 + $0x120] sm:$0xff]   ;;  %v1766_v33 = vld [vmem:[%s2296_s1 + $0x1a8] sm:$0xff]   ;;  %v37_v15 = vld [vmem:[%s2297_s0 + $0xb0] sm:$0xff] }
  0x1b   :  { %v1761_v23 = vld [vmem:[%s2296_s1 + $0x1e0] sm:$0xff]   ;;  %v64_v44 = vld [vmem:[%s2297_s0 + $0x188] sm:$0xff] }
  0x1c   :  { %1468 = vmatpush3.bf16.msra.mxu0 %v1737_v26  ;;  %v1762_v25 = vld [vmem:[%s2296_s1 + $0x1a0] sm:$0xff]   ;;  %v68_v45 = vld [vmem:[%s2297_s0 + $0x1a8] sm:$0xff] }
  0x1d   :  { %1532 = vmatpush3.bf16.msra.mxu1 %v1738_v27  ;;  %1469 = vmatprep.subr.bf16.mxu0 %v1739_v28  ;;  %v55_v26 = vld [vmem:[%s2297_s0 + $0x140] sm:$0xff]  ;;  %v1763_v28 = vld [vmem:[%s2296_s1 + $0x168] sm:$0xff]   ;;  %v1377_v59 = vcombine.low %v64_v44, %v68_v45 }
  0x1e   :  { %1533 = vmatprep.subr.bf16.mxu1 %v1740_v29  ;;  %v59_v27 = vld [vmem:[%s2297_s0 + $0x160] sm:$0xff]  ;;  %v56_v29 = vld [vmem:[%s2297_s0 + $0x148] sm:$0xff] }
  0x1f   :  { %v1368_v36 = vcombine.high %v55_v26, %v59_v27  ;;  %v1367_v47 = vcombine.low %v55_v26, %v59_v27  ;;  %v72_v56 = vld [vmem:[%s2297_s0 + $0x1c8] sm:$0xff]  ;;  %v1347_v26 = vcombine.low %v33_v14, %v37_v15 }
  0x20   :  { %1470 = vmatpush3.bf16.msra.mxu0 %v1741_v30  ;;  %v60_v30 = vld [vmem:[%s2297_s0 + $0x168] sm:$0xff] }
  0x21   :  { %1534 = vmatpush3.bf16.msra.mxu1 %v1742_v31  ;;  %1583 = vmatprep.subr.bf16.mxu0 %v1743_v40  ;;  %v1764_v31 = vld [vmem:[%s2296_s1 + $0x128] sm:$0xff]   ;;  %v1370_v37 = vcombine.high %v56_v29, %v60_v30  ;;  %v1769_v40 = vld [vmem:[%s2296_s1 + $0x1f0] sm:$0xff]  }
  0x22   :  { %1647 = vmatprep.subr.bf16.mxu1 %v1745_v42  ;;  %v67_v42 = vld [vmem:[%s2297_s0 + $0x1a0] sm:$0xff]  ;;  %v76_v57 = vld [vmem:[%s2297_s0 + $0x1e8] sm:$0xff] }
  0x23   :  { %951 = vmatmul.mubr.bf16.vlgmr.msra.gmra.mrb[0].mxu0 %v1327_v35  ;;  %v1361_v35 = vcombine.low %v48_v16, %v52_v17  ;;  %v1385_v3 = vcombine.low %v72_v56, %v76_v57  ;;  %v34_v16 = vld [vmem:[%s2297_s0 + $0x98] sm:$0xff] }
  0x24   :  { %1048 = vmatmul.mubr.bf16.vlgmr.msra.gmra.mrb[0].mxu1 %v1329_v38  ;;  %1584 = vmatpush3.bf16.msra.mxu0 %v1744_v41  ;;  %v1767_v38 = vld [vmem:[%s2296_s1 + $0x170] sm:$0xff]   ;;  %v63_v41 = vld [vmem:[%s2297_s0 + $0x180] sm:$0xff]  ;;  %v38_v17 = vld [vmem:[%s2297_s0 + $0xb8] sm:$0xff] }
  0x25   :  { %1648 = vmatpush3.bf16.msra.mxu1 %v1746_v43  ;;  %958 = vmatprep.mubr.bf16.mxu0 %v1336_v46  ;;  %v1770_v43 = vld [vmem:[%s2296_s1 + $0x1b0] sm:$0xff]   ;;  %v1771_v46 = vld [vmem:[%s2296_s1 + $0x178] sm:$0xff]   ;;  %v1375_v58 = vcombine.low %v63_v41, %v67_v42  ;;  %v1349_v27 = vcombine.low %v34_v16, %v38_v17 }
  0x26   :  { %1055 = vmatprep.mubr.bf16.mxu1 %v1338_v49  ;;  %1585 = vmatprep.subr.bf16.mxu0 %v1747_v50  ;;  %v1369_v49 = vcombine.low %v56_v29, %v60_v30  ;;  %v1376_v50 = vcombine.high %v63_v41, %v67_v42  ;;  %v49_v30 = vld [vmem:[%s2297_s0 + $0x110] sm:$0xff]  ;;  %v62_v41 = vld [vmem:[%s2297_s0 + $0x178] sm:$0xff] }
  0x27   :  { %1649 = vmatprep.subr.bf16.mxu1 %v1749_v54  ;;  %v71_v54 = vld [vmem:[%s2297_s0 + $0x1c0] sm:$0xff] }
  0x28   :  { %1586 = vmatpush3.bf16.msra.mxu0 %v1748_v52  ;;  %v1378_v52 = vcombine.high %v64_v44, %v68_v45 }
  0x29   :  { %1650 = vmatpush3.bf16.msra.mxu1 %v1750_v55  ;;  %1587 = vmatprep.subr.bf16.mxu0 %v1751_v62  ;;  %v75_v55 = vld [vmem:[%s2297_s0 + $0x1e0] sm:$0xff]  ;;  %v17_v62 = vld [vmem:[%s2297_s0 + $0x10] sm:$0xff] }
  0x2a   :  { %1651 = vmatprep.subr.bf16.mxu1 %v1753_v0  ;;  %v18_v0 = vld [vmem:[%s2297_s0 + $0x18] sm:$0xff] }
  0x2b   :  { %959 = vmatmul.mubr.bf16.gmra.mrb[4].mxu0 %v1335_v51  ;;  %v1773_v51 = vld [vmem:[%s2296_s1 + $0x1f8] sm:$0xff]  }
  0x2c   :  { %1056 = vmatmul.mubr.bf16.gmra.mrb[4].mxu1 %v1337_v53  ;;  %966 = vmatprep.mubr.bf16.mxu0 %v1344_v60  ;;  %v1774_v53 = vld [vmem:[%s2296_s1 + $0x1b8] sm:$0xff]   ;;  %v1384_v60 = vcombine.high %v71_v54, %v75_v55 }
  0x2d   :  { %1063 = vmatprep.mubr.bf16.mxu1 %v1346_v61  ;;  %1588 = vmatpush3.bf16.msra.mxu0 %v1752_v63  ;;  %v1386_v61 = vcombine.high %v72_v56, %v76_v57  ;;  %v21_v63 = vld [vmem:[%s2297_s0 + $0x30] sm:$0xff]  ;;  %v74_v56 = vld [vmem:[%s2297_s0 + $0x1d8] sm:$0xff] }
  0x2e   :  { %1652 = vmatpush3.bf16.msra.mxu1 %v1754_v1  ;;  %1589 = vmatprep.subr.bf16.mxu0 %v1755_v10  ;;  %v22_v1 = vld [vmem:[%s2297_s0 + $0x38] sm:$0xff]  ;;  %v1332_v4 = vcombine.high %v17_v62, %v21_v63  ;;  %v1331_v10 = vcombine.low %v17_v62, %v21_v63 }
  0x2f   :  { %1653 = vmatprep.subr.bf16.mxu1 %v1757_v12  ;;  %v1334_v5 = vcombine.high %v18_v0, %v22_v1  ;;  %v78_v57 = vld [vmem:[%s2297_s0 + $0x1f8] sm:$0xff] }
  0x30   :  { %v1389_v63 = vcombine.low %v74_v56, %v78_v57 }
  0x31   :  { %1590 = vmatpush3.bf16.msra.mxu0 %v1756_v11  ;;  %v1333_v11 = vcombine.low %v18_v0, %v22_v1 }
  0x32   :  { %1654 = vmatpush3.bf16.msra.mxu1 %v1758_v13  ;;  %1591 = vmatprep.subr.bf16.mxu0 %v1759_v18 }
  0x33   :  { %967 = vmatmul.mubr.bf16.gmra.mrb[8].mxu0 %v1343_v2  ;;  %1655 = vmatprep.subr.bf16.mxu1 %v1761_v23  ;;  %v1383_v2 = vcombine.low %v71_v54, %v75_v55  ;;  %v45_v23 = vld [vmem:[%s2297_s0 + $0xf0] sm:$0xff] }
  0x34   :  { %1064 = vmatmul.mubr.bf16.gmra.mrb[8].mxu1 %v1345_v6  ;;  %974 = vmatprep.mubr.bf16.mxu0 %v1352_v7  ;;  %v25_v6 = vld [vmem:[%s2297_s0 + $0x50] sm:$0xff] }
  0x35   :  { %1071 = vmatprep.mubr.bf16.mxu1 %v1354_v9  ;;  %1592 = vmatpush3.bf16.msra.mxu0 %v1760_v20  ;;  %v29_v7 = vld [vmem:[%s2297_s0 + $0x70] sm:$0xff]  ;;  %v30_v9 = vld [vmem:[%s2297_s0 + $0x78] sm:$0xff]  ;;  %v1348_v20 = vcombine.high %v33_v14, %v37_v15 }
  0x36   :  { %1656 = vmatpush3.bf16.msra.mxu1 %v1762_v25  ;;  %1593 = vmatprep.subr.bf16.mxu0 %v1763_v28  ;;  %v1340_v12 = vcombine.high %v25_v6, %v29_v7  ;;  %v1342_v13 = vcombine.high %v26_v8, %v30_v9  ;;  %v1339_v18 = vcombine.low %v25_v6, %v29_v7  ;;  %v46_v25 = vld [vmem:[%s2297_s0 + $0xf8] sm:$0xff]  ;;  %v73_v54 = vld [vmem:[%s2297_s0 + $0x1d0] sm:$0xff] }
  0x37   :  { %1657 = vmatprep.subr.bf16.mxu1 %v1765_v32  ;;  %v50_v32 = vld [vmem:[%s2297_s0 + $0x118] sm:$0xff]  ;;  %v77_v55 = vld [vmem:[%s2297_s0 + $0x1f0] sm:$0xff] }
  0x38   :  { %v1387_v62 = vcombine.low %v73_v54, %v77_v55 }
  0x39   :  { %1594 = vmatpush3.bf16.msra.mxu0 %v1764_v31  ;;  %v53_v31 = vld [vmem:[%s2297_s0 + $0x130] sm:$0xff] }
  0x3a   :  { %1658 = vmatpush3.bf16.msra.mxu1 %v1766_v33  ;;  %1595 = vmatprep.subr.bf16.mxu0 %v1767_v38  ;;  %v54_v33 = vld [vmem:[%s2297_s0 + $0x138] sm:$0xff]  ;;  %v57_v38 = vld [vmem:[%s2297_s0 + $0x150] sm:$0xff]  ;;  %v1363_v42 = vcombine.low %v49_v30, %v53_v31 }
  0x3b   :  { %975 = vmatmul.mubr.bf16.gmra.mrb[12].mxu0 %v1351_v19  ;;  %1659 = vmatprep.subr.bf16.mxu1 %v1769_v40  ;;  %v1341_v19 = vcombine.low %v26_v8, %v30_v9  ;;  %v58_v40 = vld [vmem:[%s2297_s0 + $0x158] sm:$0xff] }
  0x3c   :  { %1072 = vmatmul.mubr.bf16.gmra.mrb[12].mxu1 %v1353_v21  ;;  %982 = vmatprep.mubr.bf16.mxu0 %v1360_v22  ;;  %v1350_v21 = vcombine.high %v34_v16, %v38_v17  ;;  %v41_v22 = vld [vmem:[%s2297_s0 + $0xd0] sm:$0xff]  ;;  %v1374_v45 = vcombine.high %v58_v40, %v62_v41 }
  0x3d   :  { %1079 = vmatprep.mubr.bf16.mxu1 %v1362_v24  ;;  %1596 = vmatpush3.bf16.msra.mxu0 %v1768_v39  ;;  %v42_v24 = vld [vmem:[%s2297_s0 + $0xd8] sm:$0xff]  ;;  %v1356_v28 = vcombine.high %v41_v22, %v45_v23  ;;  %v61_v39 = vld [vmem:[%s2297_s0 + $0x170] sm:$0xff] }
  0x3e   :  { %1660 = vmatpush3.bf16.msra.mxu1 %v1770_v43  ;;  %1597 = vmatprep.subr.bf16.mxu0 %v1771_v46  ;;  %v1358_v29 = vcombine.high %v42_v24, %v46_v25  ;;  %v1365_v43 = vcombine.low %v50_v32, %v54_v33  ;;  %v1372_v44 = vcombine.high %v57_v38, %v61_v39  ;;  %v65_v46 = vld [vmem:[%s2297_s0 + $0x190] sm:$0xff] }
  0x3f   :  { %1661 = vmatprep.subr.bf16.mxu1 %v1773_v51  ;;  %v1373_v51 = vcombine.low %v58_v40, %v62_v41 }
  0x41   :  { %1598 = vmatpush3.bf16.msra.mxu0 %v1772_v48  ;;  %v66_v48 = vld [vmem:[%s2297_s0 + $0x198] sm:$0xff] }
  0x42   :  { %1662 = vmatpush3.bf16.msra.mxu1 %v1774_v53 }
  0x43   :  { %983 = vmatmul.mubr.bf16.gmra.mrb[16].mxu0 %v1359_v34  ;;  %v1355_v34 = vcombine.low %v41_v22, %v45_v23 }
  0x44   :  { %1080 = vmatmul.mubr.bf16.gmra.mrb[16].mxu1 %v1361_v35  ;;  %990 = vmatprep.mubr.bf16.mxu0 %v1368_v36  ;;  %v1357_v35 = vcombine.low %v42_v24, %v46_v25  ;;  %v1364_v36 = vcombine.high %v49_v30, %v53_v31 }
  0x45   :  { %1087 = vmatprep.mubr.bf16.mxu1 %v1370_v37  ;;  %v1366_v37 = vcombine.high %v50_v32, %v54_v33 }
  0x4b   :  { %991 = vmatmul.mubr.bf16.gmra.mrb[20].mxu0 %v1367_v47  ;;  %v69_v47 = vld [vmem:[%s2297_s0 + $0x1b0] sm:$0xff] }
  0x4c   :  { %1088 = vmatmul.mubr.bf16.gmra.mrb[20].mxu1 %v1369_v49  ;;  %998 = vmatprep.mubr.bf16.mxu0 %v1376_v50  ;;  %v70_v49 = vld [vmem:[%s2297_s0 + $0x1b8] sm:$0xff]  ;;  %v1371_v50 = vcombine.low %v57_v38, %v61_v39 }
  0x4d   :  { %1095 = vmatprep.mubr.bf16.mxu1 %v1378_v52  ;;  %v1380_v52 = vcombine.high %v65_v46, %v69_v47  ;;  %v1382_v53 = vcombine.high %v66_v48, %v70_v49 }
  0x53   :  { %999 = vmatmul.mubr.bf16.gmra.mrb[24].mxu0 %v1375_v58  ;;  %v1379_v58 = vcombine.low %v65_v46, %v69_v47 }
  0x54   :  { %1096 = vmatmul.mubr.bf16.gmra.mrb[24].mxu1 %v1377_v59  ;;  %1006 = vmatprep.mubr.bf16.mxu0 %v1384_v60  ;;  %v1381_v59 = vcombine.low %v66_v48, %v70_v49  ;;  %v1388_v60 = vcombine.high %v73_v54, %v77_v55 }
  0x55   :  { %1103 = vmatprep.mubr.bf16.mxu1 %v1386_v61  ;;  %v1390_v61 = vcombine.high %v74_v56, %v78_v57 }
  0x5b   :  { %1007 = vmatmul.mubr.bf16.gmra.mrb[28].mxu0 %v1383_v2  ;;  %v2182_v2 = vld [vmem:[%s2298_s2] ss:$0 sm:$0xff] }
  0x5c   :  { %1104 = vmatmul.mubr.bf16.gmra.mrb[28].mxu1 %v1385_v3  ;;  %1144 = vmatprep.mubr.bf16.mxu0 %v1332_v4 }
  0x5d   :  { %1241 = vmatprep.mubr.bf16.mxu1 %v1334_v5 }
  0x63   :  { %1145 = vmatmul.mubr.bf16.vlgmr.msra.gmra.mrb[32].mxu0 %v1331_v10 }
  0x64   :  { %1242 = vmatmul.mubr.bf16.vlgmr.msra.gmra.mrb[32].mxu1 %v1333_v11  ;;  %1152 = vmatprep.mubr.bf16.mxu0 %v1340_v12 }
  0x65   :  { %1249 = vmatprep.mubr.bf16.mxu1 %v1342_v13 }
  0x6b   :  { %1153 = vmatmul.mubr.bf16.gmra.mrb[36].mxu0 %v1339_v18 }
  0x6c   :  { %1250 = vmatmul.mubr.bf16.gmra.mrb[36].mxu1 %v1341_v19  ;;  %1160 = vmatprep.mubr.bf16.mxu0 %v1348_v20 }
  0x6d   :  { %1257 = vmatprep.mubr.bf16.mxu1 %v1350_v21 }
  0x73   :  { %1161 = vmatmul.mubr.bf16.gmra.mrb[40].mxu0 %v1347_v26 }
  0x74   :  { %1258 = vmatmul.mubr.bf16.gmra.mrb[40].mxu1 %v1349_v27  ;;  %1168 = vmatprep.mubr.bf16.mxu0 %v1356_v28 }
  0x75   :  { %1265 = vmatprep.mubr.bf16.mxu1 %v1358_v29 }
  0x7b   :  { %1169 = vmatmul.mubr.bf16.gmra.mrb[44].mxu0 %v1355_v34 }
  0x7c   :  { %1266 = vmatmul.mubr.bf16.gmra.mrb[44].mxu1 %v1357_v35  ;;  %1176 = vmatprep.mubr.bf16.mxu0 %v1364_v36 }
  0x7d   :  { %1273 = vmatprep.mubr.bf16.mxu1 %v1366_v37 }
  0x83   :  { %1177 = vmatmul.mubr.bf16.gmra.mrb[48].mxu0 %v1363_v42 }
  0x84   :  { %1274 = vmatmul.mubr.bf16.gmra.mrb[48].mxu1 %v1365_v43  ;;  %1184 = vmatprep.mubr.bf16.mxu0 %v1372_v44 }
  0x85   :  { %1281 = vmatprep.mubr.bf16.mxu1 %v1374_v45 }
  0x8b   :  { %1185 = vmatmul.mubr.bf16.gmra.mrb[52].mxu0 %v1371_v50 }
  0x8c   :  { %1282 = vmatmul.mubr.bf16.gmra.mrb[52].mxu1 %v1373_v51  ;;  %1192 = vmatprep.mubr.bf16.mxu0 %v1380_v52 }
  0x8d   :  { %1289 = vmatprep.mubr.bf16.mxu1 %v1382_v53 }
  0x93   :  { %1193 = vmatmul.mubr.bf16.gmra.mrb[56].mxu0 %v1379_v58 }
  0x94   :  { %1290 = vmatmul.mubr.bf16.gmra.mrb[56].mxu1 %v1381_v59  ;;  %1200 = vmatprep.mubr.bf16.mxu0 %v1388_v60 }
  0x95   :  { %1297 = vmatprep.mubr.bf16.mxu1 %v1390_v61 }
  0x9b   :  { %1201 = vmatmul.mubr.bf16.gmra.mrb[60].mxu0 %v1387_v62 }
  0x9c   :  { %1298 = vmatmul.mubr.bf16.gmra.mrb[60].mxu1 %v1389_v63 }
  0xf6   :  { %v1471_v0 = vpop.f32.mrb[0].mxu0 }
  0xf7   :  { %v1535_v1 = vpop.f32.mrb[0].mxu1  ;;  %v1472_v3 = vpop.f32.mrb[1].mxu0 }
  0xf8   :  { %v1473_v4 = vadd.f32 %v1472_v3, %v1471_v0  ;;  %v1536_v5 = vpop.f32.mrb[1].mxu1  ;;  %v1474_v6 = vpop.f32.mrb[2].mxu0 }
  0xf9   :  { %v1537_v7 = vadd.f32 %v1536_v5, %v1535_v1  ;;  %v1538_v8 = vpop.f32.mrb[2].mxu1  ;;  %v1475_v9 = vpop.f32.mrb[3].mxu0 }
  0xfa   :  { %v953_v10 = vadd.f32 %v1473_v4, %v2182_v2  ;;  %v1476_v11 = vadd.f32 %v1475_v9, %v1474_v6  ;;  %v1539_v12 = vpop.f32.mrb[3].mxu1 }
  0xfb   :  { %v1540_v13 = vadd.f32 %v1539_v12, %v1538_v8 }
  0xfc   :  { %v2185_v14 = vadd.f32 %v1537_v7, %v953_v10  ;;  %v956_v15 = vadd.f32 %v1476_v11, %v2182_v2 }
  0xfe   :  { %v2188_v16 = vadd.f32 %v1540_v13, %v956_v15  ;;  %v1477_v17 = vpop.f32.mrb[4].mxu0 }
  0xff   :  { %v1541_v18 = vpop.f32.mrb[4].mxu1  ;;  %v1478_v19 = vpop.f32.mrb[5].mxu0 }
 0x100   :  { %v1479_v20 = vadd.f32 %v1478_v19, %v1477_v17  ;;  %v1542_v21 = vpop.f32.mrb[5].mxu1  ;;  %v1480_v22 = vpop.f32.mrb[6].mxu0 }
 0x101   :  { %v1543_v23 = vadd.f32 %v1542_v21, %v1541_v18  ;;  %v1544_v24 = vpop.f32.mrb[6].mxu1  ;;  %v1481_v25 = vpop.f32.mrb[7].mxu0 }
 0x102   :  { %v961_v26 = vadd.f32 %v1479_v20, %v2182_v2  ;;  %v1482_v27 = vadd.f32 %v1481_v25, %v1480_v22  ;;  %v1545_v28 = vpop.f32.mrb[7].mxu1 }
 0x103   :  { %v1546_v29 = vadd.f32 %v1545_v28, %v1544_v24 }
 0x104   :  { %v2191_v30 = vadd.f32 %v1543_v23, %v961_v26  ;;  %v964_v31 = vadd.f32 %v1482_v27, %v2182_v2 }
 0x106   :  { %v2194_v32 = vadd.f32 %v1546_v29, %v964_v31  ;;  %v1483_v33 = vpop.f32.mrb[8].mxu0 }
 0x107   :  { %v1547_v34 = vpop.f32.mrb[8].mxu1  ;;  %v1484_v35 = vpop.f32.mrb[9].mxu0 }
 0x108   :  { %v1485_v36 = vadd.f32 %v1484_v35, %v1483_v33  ;;  %v1548_v37 = vpop.f32.mrb[9].mxu1  ;;  %v1486_v38 = vpop.f32.mrb[10].mxu0 }
 0x109   :  { %v1549_v39 = vadd.f32 %v1548_v37, %v1547_v34  ;;  %v1550_v40 = vpop.f32.mrb[10].mxu1  ;;  %v1487_v41 = vpop.f32.mrb[11].mxu0 }
 0x10a   :  { %v969_v42 = vadd.f32 %v1485_v36, %v2182_v2  ;;  %v1488_v43 = vadd.f32 %v1487_v41, %v1486_v38  ;;  %v1551_v44 = vpop.f32.mrb[11].mxu1 }
 0x10b   :  { %v1552_v45 = vadd.f32 %v1551_v44, %v1550_v40 }
 0x10c   :  { %v2197_v46 = vadd.f32 %v1549_v39, %v969_v42  ;;  %v972_v47 = vadd.f32 %v1488_v43, %v2182_v2 }
 0x10e   :  { %v2200_v48 = vadd.f32 %v1552_v45, %v972_v47  ;;  %v1489_v49 = vpop.f32.mrb[12].mxu0 }
 0x10f   :  { %v1553_v50 = vpop.f32.mrb[12].mxu1  ;;  %v1490_v51 = vpop.f32.mrb[13].mxu0 }
 0x110   :  { %v1491_v52 = vadd.f32 %v1490_v51, %v1489_v49  ;;  %v1554_v53 = vpop.f32.mrb[13].mxu1  ;;  %v1492_v54 = vpop.f32.mrb[14].mxu0 }
 0x111   :  { %v1555_v55 = vadd.f32 %v1554_v53, %v1553_v50  ;;  %v1556_v56 = vpop.f32.mrb[14].mxu1  ;;  %v1493_v57 = vpop.f32.mrb[15].mxu0 }
 0x112   :  { %v977_v58 = vadd.f32 %v1491_v52, %v2182_v2  ;;  %v1494_v59 = vadd.f32 %v1493_v57, %v1492_v54  ;;  %v1557_v60 = vpop.f32.mrb[15].mxu1 }
 0x113   :  { %v1558_v61 = vadd.f32 %v1557_v60, %v1556_v56 }
 0x114   :  { %v2203_v62 = vadd.f32 %v1555_v55, %v977_v58  ;;  %v980_v63 = vadd.f32 %v1494_v59, %v2182_v2 }
 0x116   :  { %v2206_v0 = vadd.f32 %v1558_v61, %v980_v63  ;;  %v1495_v1 = vpop.f32.mrb[16].mxu0 }
 0x117   :  { %v1559_v3 = vpop.f32.mrb[16].mxu1  ;;  %v1496_v4 = vpop.f32.mrb[17].mxu0 }
 0x118   :  { %v1497_v5 = vadd.f32 %v1496_v4, %v1495_v1  ;;  %v1560_v6 = vpop.f32.mrb[17].mxu1  ;;  %v1498_v7 = vpop.f32.mrb[18].mxu0 }
 0x119   :  { %v1561_v8 = vadd.f32 %v1560_v6, %v1559_v3  ;;  %v1562_v9 = vpop.f32.mrb[18].mxu1  ;;  %v1499_v10 = vpop.f32.mrb[19].mxu0 }
 0x11a   :  { %v985_v11 = vadd.f32 %v1497_v5, %v2182_v2  ;;  %v1500_v12 = vadd.f32 %v1499_v10, %v1498_v7  ;;  %v1563_v13 = vpop.f32.mrb[19].mxu1 }
 0x11b   :  { %v1564_v15 = vadd.f32 %v1563_v13, %v1562_v9 }
 0x11c   :  { %v2209_v17 = vadd.f32 %v1561_v8, %v985_v11  ;;  %v988_v18 = vadd.f32 %v1500_v12, %v2182_v2 }
 0x11e   :  { %v2212_v19 = vadd.f32 %v1564_v15, %v988_v18  ;;  %v1501_v20 = vpop.f32.mrb[20].mxu0 }
 0x11f   :  { %v1565_v21 = vpop.f32.mrb[20].mxu1  ;;  %v1502_v22 = vpop.f32.mrb[21].mxu0 }
 0x120   :  { %v1503_v23 = vadd.f32 %v1502_v22, %v1501_v20  ;;  %v1566_v24 = vpop.f32.mrb[21].mxu1  ;;  %v1504_v25 = vpop.f32.mrb[22].mxu0 }
 0x121   :  { %v1567_v26 = vadd.f32 %v1566_v24, %v1565_v21  ;;  %v1568_v27 = vpop.f32.mrb[22].mxu1  ;;  %v1505_v28 = vpop.f32.mrb[23].mxu0 }
 0x122   :  { %v993_v29 = vadd.f32 %v1503_v23, %v2182_v2  ;;  %v1506_v31 = vadd.f32 %v1505_v28, %v1504_v25  ;;  %v1569_v33 = vpop.f32.mrb[23].mxu1 }
 0x123   :  { %v1570_v34 = vadd.f32 %v1569_v33, %v1568_v27 }
 0x124   :  { %v2215_v35 = vadd.f32 %v1567_v26, %v993_v29  ;;  %v996_v36 = vadd.f32 %v1506_v31, %v2182_v2 }
 0x126   :  { %v2218_v37 = vadd.f32 %v1570_v34, %v996_v36  ;;  %v1507_v38 = vpop.f32.mrb[24].mxu0 }
 0x127   :  { %v1571_v39 = vpop.f32.mrb[24].mxu1  ;;  %v1508_v40 = vpop.f32.mrb[25].mxu0 }
 0x128   :  { %v1509_v41 = vadd.f32 %v1508_v40, %v1507_v38  ;;  %v1572_v42 = vpop.f32.mrb[25].mxu1  ;;  %v1510_v43 = vpop.f32.mrb[26].mxu0 }
 0x129   :  { %v1573_v44 = vadd.f32 %v1572_v42, %v1571_v39  ;;  %v1574_v45 = vpop.f32.mrb[26].mxu1  ;;  %v1511_v47 = vpop.f32.mrb[27].mxu0 }
 0x12a   :  { %v1001_v49 = vadd.f32 %v1509_v41, %v2182_v2  ;;  %v1512_v50 = vadd.f32 %v1511_v47, %v1510_v43  ;;  %v1575_v51 = vpop.f32.mrb[27].mxu1 }
 0x12b   :  { %v1576_v52 = vadd.f32 %v1575_v51, %v1574_v45 }
 0x12c   :  { %v2221_v53 = vadd.f32 %v1573_v44, %v1001_v49  ;;  %v1004_v54 = vadd.f32 %v1512_v50, %v2182_v2 }
 0x12e   :  { %v2224_v55 = vadd.f32 %v1576_v52, %v1004_v54  ;;  %v1513_v56 = vpop.f32.mrb[28].mxu0 }
 0x12f   :  { %v1577_v57 = vpop.f32.mrb[28].mxu1  ;;  %v1514_v58 = vpop.f32.mrb[29].mxu0 }
 0x130   :  { %v1515_v59 = vadd.f32 %v1514_v58, %v1513_v56  ;;  %v1578_v60 = vpop.f32.mrb[29].mxu1  ;;  %v1516_v61 = vpop.f32.mrb[30].mxu0 }
 0x131   :  { %v1579_v63 = vadd.f32 %v1578_v60, %v1577_v57  ;;  %v1580_v1 = vpop.f32.mrb[30].mxu1  ;;  %v1517_v3 = vpop.f32.mrb[31].mxu0 }
 0x132   :  { %v1009_v4 = vadd.f32 %v1515_v59, %v2182_v2  ;;  %v1518_v5 = vadd.f32 %v1517_v3, %v1516_v61  ;;  %v1581_v6 = vpop.f32.mrb[31].mxu1 }
 0x133   :  { %v1582_v7 = vadd.f32 %v1581_v6, %v1580_v1 }
 0x134   :  { %v2227_v8 = vadd.f32 %v1579_v63, %v1009_v4  ;;  %v1012_v9 = vadd.f32 %v1518_v5, %v2182_v2 }
 0x136   :  { %v2230_v10 = vadd.f32 %v1582_v7, %v1012_v9  ;;  %v1599_v11 = vpop.f32.mrb[32].mxu0 }
 0x137   :  { %v1663_v12 = vpop.f32.mrb[32].mxu1  ;;  %v1600_v13 = vpop.f32.mrb[33].mxu0 }
 0x138   :  { %v1601_v15 = vadd.f32 %v1600_v13, %v1599_v11  ;;  %v1664_v18 = vpop.f32.mrb[33].mxu1  ;;  %v1602_v20 = vpop.f32.mrb[34].mxu0 }
 0x139   :  { %v1665_v21 = vadd.f32 %v1664_v18, %v1663_v12  ;;  %v1666_v22 = vpop.f32.mrb[34].mxu1  ;;  %v1603_v23 = vpop.f32.mrb[35].mxu0 }
 0x13a   :  { %v1147_v24 = vadd.f32 %v1601_v15, %v2185_v14  ;;  %v1604_v25 = vadd.f32 %v1603_v23, %v1602_v20  ;;  %v1667_v26 = vpop.f32.mrb[35].mxu1 }
 0x13b   :  { %v1668_v27 = vadd.f32 %v1667_v26, %v1666_v22 }
 0x13c   :  { %v1244_v28 = vadd.f32 %v1665_v21, %v1147_v24  ;;  %v1150_v29 = vadd.f32 %v1604_v25, %v2188_v16 }
 0x13e   :  { %1306 = vst [vmem:[%s2299_s3] sm:$0xff] %v1244_v28  ;;  %v1247_v2 = vadd.f32 %v1668_v27, %v1150_v29  ;;  %v1605_v31 = vpop.f32.mrb[36].mxu0 }
 0x13f   :  { %v1669_v33 = vpop.f32.mrb[36].mxu1  ;;  %v1606_v34 = vpop.f32.mrb[37].mxu0 }
 0x140   :  { %1307 = vst [vmem:[%s2299_s3 + $0x8] sm:$0xff] %v1247_v2  ;;  %v1607_v36 = vadd.f32 %v1606_v34, %v1605_v31  ;;  %v1670_v14 = vpop.f32.mrb[37].mxu1  ;;  %v1608_v38 = vpop.f32.mrb[38].mxu0 }
 0x141   :  { %v1671_v39 = vadd.f32 %v1670_v14, %v1669_v33  ;;  %v1672_v40 = vpop.f32.mrb[38].mxu1  ;;  %v1609_v41 = vpop.f32.mrb[39].mxu0 }
 0x142   :  { %v1155_v16 = vadd.f32 %v1607_v36, %v2191_v30  ;;  %v1610_v42 = vadd.f32 %v1609_v41, %v1608_v38  ;;  %v1673_v43 = vpop.f32.mrb[39].mxu1 }
 0x143   :  { %v1674_v44 = vadd.f32 %v1673_v43, %v1672_v40 }
 0x144   :  { %v1252_v45 = vadd.f32 %v1671_v39, %v1155_v16  ;;  %v1158_v47 = vadd.f32 %v1610_v42, %v2194_v32 }
 0x146   :  { %1308 = vst [vmem:[%s2299_s3 + $0x10] sm:$0xff] %v1252_v45  ;;  %v1255_v49 = vadd.f32 %v1674_v44, %v1158_v47  ;;  %v1611_v50 = vpop.f32.mrb[40].mxu0 }
 0x147   :  { %v1675_v51 = vpop.f32.mrb[40].mxu1  ;;  %v1612_v52 = vpop.f32.mrb[41].mxu0 }
 0x148   :  { %1309 = vst [vmem:[%s2299_s3 + $0x18] sm:$0xff] %v1255_v49  ;;  %v1613_v54 = vadd.f32 %v1612_v52, %v1611_v50  ;;  %v1676_v30 = vpop.f32.mrb[41].mxu1  ;;  %v1614_v56 = vpop.f32.mrb[42].mxu0 }
 0x149   :  { %v1677_v57 = vadd.f32 %v1676_v30, %v1675_v51  ;;  %v1678_v58 = vpop.f32.mrb[42].mxu1  ;;  %v1615_v59 = vpop.f32.mrb[43].mxu0 }
 0x14a   :  { %v1163_v32 = vadd.f32 %v1613_v54, %v2197_v46  ;;  %v1616_v60 = vadd.f32 %v1615_v59, %v1614_v56  ;;  %v1679_v61 = vpop.f32.mrb[43].mxu1 }
 0x14b   :  { %v1680_v63 = vadd.f32 %v1679_v61, %v1678_v58 }
 0x14c   :  { %v1260_v1 = vadd.f32 %v1677_v57, %v1163_v32  ;;  %v1166_v3 = vadd.f32 %v1616_v60, %v2200_v48 }
 0x14e   :  { %1310 = vst [vmem:[%s2299_s3 + $0x20] sm:$0xff] %v1260_v1  ;;  %v1263_v4 = vadd.f32 %v1680_v63, %v1166_v3  ;;  %v1617_v5 = vpop.f32.mrb[44].mxu0 }
 0x14f   :  { %v1681_v6 = vpop.f32.mrb[44].mxu1  ;;  %v1618_v7 = vpop.f32.mrb[45].mxu0 }
 0x150   :  { %1311 = vst [vmem:[%s2299_s3 + $0x28] sm:$0xff] %v1263_v4  ;;  %v1619_v9 = vadd.f32 %v1618_v7, %v1617_v5  ;;  %v1682_v46 = vpop.f32.mrb[45].mxu1  ;;  %v1620_v11 = vpop.f32.mrb[46].mxu0 }
 0x151   :  { %v1683_v12 = vadd.f32 %v1682_v46, %v1681_v6  ;;  %v1684_v13 = vpop.f32.mrb[46].mxu1  ;;  %v1621_v15 = vpop.f32.mrb[47].mxu0 }
 0x152   :  { %v1171_v48 = vadd.f32 %v1619_v9, %v2203_v62  ;;  %v1622_v18 = vadd.f32 %v1621_v15, %v1620_v11  ;;  %v1685_v20 = vpop.f32.mrb[47].mxu1 }
 0x153   :  { %v1686_v21 = vadd.f32 %v1685_v20, %v1684_v13 }
 0x154   :  { %v1268_v22 = vadd.f32 %v1683_v12, %v1171_v48  ;;  %v1174_v23 = vadd.f32 %v1622_v18, %v2206_v0 }
 0x156   :  { %1312 = vst [vmem:[%s2299_s3 + $0x30] sm:$0xff] %v1268_v22  ;;  %v1271_v24 = vadd.f32 %v1686_v21, %v1174_v23  ;;  %v1623_v25 = vpop.f32.mrb[48].mxu0 }
 0x157   :  { %v1687_v26 = vpop.f32.mrb[48].mxu1  ;;  %v1624_v27 = vpop.f32.mrb[49].mxu0 }
 0x158   :  { %1313 = vst [vmem:[%s2299_s3 + $0x38] sm:$0xff] %v1271_v24  ;;  %v1625_v28 = vadd.f32 %v1624_v27, %v1623_v25  ;;  %v1688_v62 = vpop.f32.mrb[49].mxu1  ;;  %v1626_v29 = vpop.f32.mrb[50].mxu0 }
 0x159   :  { %v1689_v2 = vadd.f32 %v1688_v62, %v1687_v26  ;;  %v1690_v31 = vpop.f32.mrb[50].mxu1  ;;  %v1627_v33 = vpop.f32.mrb[51].mxu0 }
 0x15a   :  { %v1179_v0 = vadd.f32 %v1625_v28, %v2209_v17  ;;  %v1628_v34 = vadd.f32 %v1627_v33, %v1626_v29  ;;  %v1691_v36 = vpop.f32.mrb[51].mxu1 }
 0x15b   :  { %v1692_v14 = vadd.f32 %v1691_v36, %v1690_v31 }
 0x15c   :  { %v1276_v38 = vadd.f32 %v1689_v2, %v1179_v0  ;;  %v1182_v39 = vadd.f32 %v1628_v34, %v2212_v19 }
 0x15e   :  { %1314 = vst [vmem:[%s2299_s3 + $0x40] sm:$0xff] %v1276_v38  ;;  %v1279_v40 = vadd.f32 %v1692_v14, %v1182_v39  ;;  %v1629_v41 = vpop.f32.mrb[52].mxu0 }
 0x15f   :  { %v1693_v16 = vpop.f32.mrb[52].mxu1  ;;  %v1630_v42 = vpop.f32.mrb[53].mxu0 }
 0x160   :  { %1315 = vst [vmem:[%s2299_s3 + $0x48] sm:$0xff] %v1279_v40  ;;  %v1631_v43 = vadd.f32 %v1630_v42, %v1629_v41  ;;  %v1694_v17 = vpop.f32.mrb[53].mxu1  ;;  %v1632_v44 = vpop.f32.mrb[54].mxu0 }
 0x161   :  { %v1695_v45 = vadd.f32 %v1694_v17, %v1693_v16  ;;  %v1696_v47 = vpop.f32.mrb[54].mxu1  ;;  %v1633_v49 = vpop.f32.mrb[55].mxu0 }
 0x162   :  { %v1187_v19 = vadd.f32 %v1631_v43, %v2215_v35  ;;  %v1634_v50 = vadd.f32 %v1633_v49, %v1632_v44  ;;  %v1697_v51 = vpop.f32.mrb[55].mxu1 }
 0x163   :  { %v1698_v52 = vadd.f32 %v1697_v51, %v1696_v47 }
 0x164   :  { %v1284_v54 = vadd.f32 %v1695_v45, %v1187_v19  ;;  %v1190_v30 = vadd.f32 %v1634_v50, %v2218_v37 }
 0x166   :  { %1316 = vst [vmem:[%s2299_s3 + $0x50] sm:$0xff] %v1284_v54  ;;  %v1287_v56 = vadd.f32 %v1698_v52, %v1190_v30  ;;  %v1635_v57 = vpop.f32.mrb[56].mxu0 }
 0x167   :  { %v1699_v58 = vpop.f32.mrb[56].mxu1  ;;  %v1636_v59 = vpop.f32.mrb[57].mxu0 }
 0x168   :  { %1317 = vst [vmem:[%s2299_s3 + $0x58] sm:$0xff] %v1287_v56  ;;  %v1637_v32 = vadd.f32 %v1636_v59, %v1635_v57  ;;  %v1700_v35 = vpop.f32.mrb[57].mxu1  ;;  %v1638_v60 = vpop.f32.mrb[58].mxu0 }
 0x169   :  { %v1701_v61 = vadd.f32 %v1700_v35, %v1699_v58  ;;  %v1702_v63 = vpop.f32.mrb[58].mxu1  ;;  %v1639_v1 = vpop.f32.mrb[59].mxu0 }
 0x16a   :  { %v1195_v37 = vadd.f32 %v1637_v32, %v2221_v53  ;;  %v1640_v3 = vadd.f32 %v1639_v1, %v1638_v60  ;;  %v1703_v4 = vpop.f32.mrb[59].mxu1 }
 0x16b   :  { %v1704_v5 = vadd.f32 %v1703_v4, %v1702_v63 }
 0x16c   :  { %v1292_v6 = vadd.f32 %v1701_v61, %v1195_v37  ;;  %v1198_v7 = vadd.f32 %v1640_v3, %v2224_v55 }
 0x16e   :  { %1318 = vst [vmem:[%s2299_s3 + $0x60] sm:$0xff] %v1292_v6  ;;  %v1295_v9 = vadd.f32 %v1704_v5, %v1198_v7  ;;  %v1641_v46 = vpop.f32.mrb[60].mxu0 }
 0x16f   :  { %v1705_v11 = vpop.f32.mrb[60].mxu1  ;;  %v1642_v12 = vpop.f32.mrb[61].mxu0 }
 0x170   :  { %1319 = vst [vmem:[%s2299_s3 + $0x68] sm:$0xff] %v1295_v9  ;;  %v1643_v13 = vadd.f32 %v1642_v12, %v1641_v46  ;;  %v1706_v53 = vpop.f32.mrb[61].mxu1  ;;  %v1644_v15 = vpop.f32.mrb[62].mxu0 }
 0x171   :  { %v1707_v48 = vadd.f32 %v1706_v53, %v1705_v11  ;;  %v1708_v18 = vpop.f32.mrb[62].mxu1  ;;  %v1645_v20 = vpop.f32.mrb[63].mxu0 }
 0x172   :  { %v1203_v55 = vadd.f32 %v1643_v13, %v2227_v8  ;;  %v1646_v21 = vadd.f32 %v1645_v20, %v1644_v15  ;;  %v1709_v22 = vpop.f32.mrb[63].mxu1 }
 0x173   :  { %v1710_v23 = vadd.f32 %v1709_v22, %v1708_v18 }
 0x174   :  { %v1300_v24 = vadd.f32 %v1707_v48, %v1203_v55  ;;  %v1206_v25 = vadd.f32 %v1646_v21, %v2230_v10 }
 0x176   :  { %1320 = vst [vmem:[%s2299_s3 + $0x70] sm:$0xff] %v1300_v24  ;;  %v1303_v26 = vadd.f32 %v1710_v23, %v1206_v25 }
 0x178   :  { %1321 = vst [vmem:[%s2299_s3 + $0x78] sm:$0xff] %v1303_v26 }

</bundles_post_ra>
